<compile_context>
chip_gen: v6e
topology: v6e:2x2x1
jax: 0.10.0
libtpu: 0.0.40
codegen_flags: <defaults>
</compile_context>

<pallas_src>
import functools

import jax
import jax.numpy as jnp
from jax.experimental import pallas as pl
from jax.experimental.pallas import tpu as pltpu


def _window_attention_kernel(x_ref, wqkv_ref, bqkv_ref, wproj_ref, bproj_ref,
                             bias_ref, o_ref, *, num_heads):
    """One grid step == one batch of Bt windows (all heads at once)."""
    bt, n, c = x_ref.shape
    hd = c // num_heads
    m = bt * n

    # ---- qkv projection on the flattened (Bt*N, C) slab (bf16 MXU, f32 acc).
    # The qk scale is already folded into the q columns of wqkv / bqkv.
    x2 = x_ref[...].reshape(m, c)                                       # bf16
    qkv = jnp.dot(x2, wqkv_ref[...], preferred_element_type=jnp.float32)
    qkv = (qkv + bqkv_ref[...]).astype(jnp.bfloat16)                    # one cast

    # ---- head-major (H*Bt, N, hd) operands; trailing dims stay (N, hd).
    def split_heads(base):
        cols = [qkv[:, base + h * hd: base + (h + 1) * hd]
                for h in range(num_heads)]
        return jnp.stack(cols, axis=0).reshape(num_heads * bt, n, hd)

    q_b = split_heads(0)
    k_b = split_heads(c)
    v_b = split_heads(2 * c)

    # ---- scores for every (head, window) pair in one batched MXU stream.
    s = jnp.einsum('znd,zmd->znm', q_b, k_b,
                   preferred_element_type=jnp.float32)                  # (H*Bt,N,N)
    s = s.reshape(num_heads, bt, n, n) + bias_ref[...][:, None]         # rel-pos bias
    s = s.reshape(num_heads * bt, n, n)

    # numerically stable softmax in f32; approx reciprocal uses the EUP slot
    # (rows then do not sum to exactly 1 — consistent with the 2e-2 tolerance).
    s = s - jnp.max(s, axis=-1, keepdims=True)
    p = jnp.exp(s)
    p = p * pl.reciprocal(jnp.sum(p, axis=-1, keepdims=True), approx=True)
    p = p.astype(jnp.bfloat16)

    o_b = jnp.einsum('znm,zmd->znd', p, v_b,
                     preferred_element_type=jnp.float32)                # (H*Bt,N,hd)
    o_b = o_b.reshape(num_heads, m, hd).astype(jnp.bfloat16)            # one cast

    # ---- concat(heads) @ Wproj folded as sum_h o_h @ Wproj[h]:
    # one batched matmul over the (major) head axis + a cheap leading reduce.
    y = jnp.einsum('hmd,hdc->hmc', o_b, wproj_ref[...],
                   preferred_element_type=jnp.float32).sum(axis=0)      # (m, C)
    y = y + bproj_ref[...]
    o_ref[...] = y.reshape(bt, n, c).astype(o_ref.dtype)


def window_attention(x, params, window_size, max_window_size, num_heads,
                     block_windows=None):
    """x: (B_, N, C) float32.  Returns (B_, N, C) float32."""
    B_, N, C = x.shape
    assert N == window_size[0] * window_size[1]
    assert C % num_heads == 0
    head_dim = C // num_heads
    scale = head_dim ** (-0.5)

    # ---- glue: relative position index + bias-table gather (plain JAX) ----
    coords_h = jnp.arange(window_size[0])
    coords_w = jnp.arange(window_size[1])
    coords = jnp.stack(jnp.meshgrid(coords_h, coords_w, indexing="ij"))   # (2,Wh,Ww)
    coords_flatten = coords.reshape(2, -1)                                 # (2, N)
    rel = coords_flatten[:, :, None] - coords_flatten[:, None, :]          # (2, N, N)
    rel = rel.transpose(1, 2, 0)                                           # (N, N, 2)
    rel = rel.at[:, :, 0].add(max_window_size[0] - 1)
    rel = rel.at[:, :, 1].add(max_window_size[1] - 1)
    rel = rel.at[:, :, 0].multiply(2 * max_window_size[1] - 1)
    relative_position_index = rel.sum(-1)                                  # (N, N)

    table = params["rel_pos_bias_table"]                                   # (max_pos, H)
    rel_bias = table[relative_position_index.reshape(-1)].reshape(N, N, num_heads)
    rel_bias = jnp.transpose(rel_bias, (2, 0, 1)).astype(jnp.float32)      # (H, N, N)

    # ---- parameter prep: fold the qk scale into the q columns (constant
    # transform on weights, not per-call data); bf16 MXU operands, f32 biases.
    qk_scale_vec = jnp.concatenate([jnp.full((C,), scale, jnp.float32),
                                    jnp.ones((2 * C,), jnp.float32)])
    w_qkv = (params["w_qkv"].astype(jnp.float32) * qk_scale_vec[None, :]
             ).astype(jnp.bfloat16)                                        # (C, 3C)
    b_qkv = (params["b_qkv"].astype(jnp.float32) * qk_scale_vec
             ).reshape(1, 3 * C).astype(jnp.float32)
    w_proj = params["w_proj"].reshape(num_heads, head_dim, C).astype(jnp.bfloat16)
    b_proj = params["b_proj"].reshape(1, C).astype(jnp.float32)

    # ---- window-batch tile: lane-padding-aware live-VMEM estimate (~12 MiB
    # budget), bt capped at 128 and at ceil(B_/2) so the grid has >= 2 steps.
    if block_windows is None:
        lane = 128
        cpad = pl.cdiv(C, lane) * lane
        c3pad = pl.cdiv(3 * C, lane) * lane
        hpad = pl.cdiv(head_dim, lane) * lane
        npad = pl.cdiv(N, lane) * lane
        per_win = N * (
            2 * 2 * cpad                        # x block (bf16), double-buffered
            + (4 + 2) * c3pad                   # qkv slab f32 + bf16 copy
            + 3 * 2 * num_heads * hpad          # head-major q/k/v (bf16)
            + (4 + 2) * num_heads * npad        # scores f32 + probs bf16
            + (4 + 2) * num_heads * hpad        # attn@v f32 + bf16 copy
            + 4 * num_heads * cpad + 4 * cpad   # per-head proj partials + y (f32)
            + 2 * 4 * cpad                      # out block (f32), double-buffered
        )
        block_windows = max(1, (12 * 1024 * 1024) // max(per_win, 1))

    bt = int(min(block_windows, 128, B_))
    if B_ >= 2:
        bt = min(bt, pl.cdiv(B_, 2))            # >= 2 grid steps (megacore / DMA overlap)
    bt = max(bt, 1)
    n_blocks = pl.cdiv(B_, bt)
    B_pad = n_blocks * bt

    x_in = x.astype(jnp.bfloat16)
    if B_pad != B_:
        x_in = jnp.pad(x_in, ((0, B_pad - B_), (0, 0), (0, 0)))

    kernel = functools.partial(_window_attention_kernel, num_heads=num_heads)
    const1 = pl.Buffered(1)                      # single-buffer grid-invariant operands

    out = pl.pallas_call(
        kernel,
        out_shape=jax.ShapeDtypeStruct((B_pad, N, C), x.dtype),
        grid_spec=pltpu.PrefetchScalarGridSpec(
            num_scalar_prefetch=0,
            grid=(n_blocks,),
            in_specs=[
                pl.BlockSpec((bt, N, C), lambda b: (b, 0, 0)),                   # x
                pl.BlockSpec((C, 3 * C), lambda b: (0, 0),
                             pipeline_mode=const1),                              # w_qkv
                pl.BlockSpec((1, 3 * C), lambda b: (0, 0),
                             pipeline_mode=const1),                              # b_qkv
                pl.BlockSpec((num_heads, head_dim, C), lambda b: (0, 0, 0),
                             pipeline_mode=const1),                              # w_proj
                pl.BlockSpec((1, C), lambda b: (0, 0),
                             pipeline_mode=const1),                              # b_proj
                pl.BlockSpec((num_heads, N, N), lambda b: (0, 0, 0),
                             pipeline_mode=const1),                              # rel bias
            ],
            out_specs=pl.BlockSpec((bt, N, C), lambda b: (b, 0, 0)),
        ),
        compiler_params=pltpu.CompilerParams(
            dimension_semantics=("parallel",),
            vmem_limit_bytes=40 * 1024 * 1024),
    )(x_in, w_qkv, b_qkv, w_proj, b_proj, rel_bias)

    if B_pad != B_:
        out = out[:B_]
    return out


def _reference(x, params, window_size, max_window_size, num_heads):
    """Pure-JAX f32 reference of the PyTorch forward (eval mode, dropout=0)."""
    B_, N, C = x.shape
    head_dim = C // num_heads
    scale = head_dim ** (-0.5)

    coords_h = jnp.arange(window_size[0])
    coords_w = jnp.arange(window_size[1])
    coords = jnp.stack(jnp.meshgrid(coords_h, coords_w, indexing="ij"))
    cf = coords.reshape(2, -1)
    rel = (cf[:, :, None] - cf[:, None, :]).transpose(1, 2, 0)
    rel = rel.at[:, :, 0].add(max_window_size[0] - 1)
    rel = rel.at[:, :, 1].add(max_window_size[1] - 1)
    rel = rel.at[:, :, 0].multiply(2 * max_window_size[1] - 1)
    rpi = rel.sum(-1)

    qkv = x @ params["w_qkv"] + params["b_qkv"]
    qkv = qkv.reshape(B_, N, 3, num_heads, head_dim).transpose(2, 0, 3, 1, 4)
    q, k, v = qkv[0], qkv[1], qkv[2]
    q = q * scale
    attn = q @ jnp.swapaxes(k, -2, -1)
    bias = params["rel_pos_bias_table"][rpi.reshape(-1)].reshape(N, N, num_heads)
    bias = jnp.transpose(bias, (2, 0, 1))
    attn = attn + bias[None]
    attn = jax.nn.softmax(attn, axis=-1)
    out = (attn @ v).transpose(0, 2, 1, 3).reshape(B_, N, C)
    return out @ params["w_proj"] + params["b_proj"]


if __name__ == "__main__":
    key = jax.random.PRNGKey(0)
    dim = 32
    num_heads = 2
    max_window_size = (8, 32)
    window_size = (4, 8)                   # N = 32
    B_ = 5                                 # odd -> exercises the padding path (bt=3, 2 steps)
    N = window_size[0] * window_size[1]
    max_positions = (2 * max_window_size[0] - 1) * (2 * max_window_size[1] - 1)

    ks = jax.random.split(key, 7)
    params = {
        # trunc_normal_(std=0.02) approximated deterministically with normal*0.02
        "rel_pos_bias_table": 0.02 * jax.random.normal(ks[0], (max_positions, num_heads), jnp.float32),
        "w_qkv": 0.1 * jax.random.normal(ks[1], (dim, 3 * dim), jnp.float32),
        "b_qkv": 0.1 * jax.random.normal(ks[2], (3 * dim,), jnp.float32),
        "w_proj": 0.1 * jax.random.normal(ks[3], (dim, dim), jnp.float32),
        "b_proj": 0.1 * jax.random.normal(ks[4], (dim,), jnp.float32),
    }
    x = jax.random.normal(ks[5], (B_, N, dim), jnp.float32)
    # q_global is an argument of the PyTorch forward but is never used by it.
    q_global = jax.random.normal(ks[6], (B_, num_heads, N, dim // num_heads), jnp.float32)

    # TODO(synk): attn_drop / proj_drop are identity in eval mode (rate 0.0), so dropout is omitted.
    out = window_attention(x, params, window_size, max_window_size, num_heads)
    out = jax.block_until_ready(out)

    ref = _reference(x, params, window_size, max_window_size, num_heads)
    assert out.shape == (B_, N, dim)
    # bf16 MXU operands with f32 accumulation -> loosened tolerance vs. f32 reference.
    assert jnp.allclose(out, ref, rtol=2e-2, atol=2e-2), "mismatch vs reference"
    print("KERNEL_OK")
</pallas_src>

<mosaic_0001>
module attributes {stable_mosaic.version = 11 : i64} {
  func.func @_window_attention_kernel(%arg0: i32, %arg1: memref<3x32x32xbf16, #tpu.memory_space<vmem>>, %arg2: memref<32x96xbf16, #tpu.memory_space<vmem>>, %arg3: memref<1x96xf32, #tpu.memory_space<vmem>>, %arg4: memref<2x16x32xbf16, #tpu.memory_space<vmem>>, %arg5: memref<1x32xf32, #tpu.memory_space<vmem>>, %arg6: memref<2x32x32xf32, #tpu.memory_space<vmem>>, %arg7: memref<3x32x32xf32, #tpu.memory_space<vmem>>) attributes {dimension_semantics = [#tpu.dimension_semantics<parallel>], iteration_bounds = array<i64: 2>, scalar_prefetch = 0 : i64, scratch_operands = 0 : i64, tpu.core_type = #tpu.core_type<tc>, window_params = [{transform_indices = @transform_0, window_bounds = array<i64: 3, 32, 32>}, {pipeline_mode = #tpu.pipeline_mode<synchronous>, transform_indices = @transform_1, window_bounds = array<i64: 32, 96>}, {pipeline_mode = #tpu.pipeline_mode<synchronous>, transform_indices = @transform_2, window_bounds = array<i64: 1, 96>}, {pipeline_mode = #tpu.pipeline_mode<synchronous>, transform_indices = @transform_3, window_bounds = array<i64: 2, 16, 32>}, {pipeline_mode = #tpu.pipeline_mode<synchronous>, transform_indices = @transform_4, window_bounds = array<i64: 1, 32>}, {pipeline_mode = #tpu.pipeline_mode<synchronous>, transform_indices = @transform_5, window_bounds = array<i64: 2, 32, 32>}, {transform_indices = @transform_6, window_bounds = array<i64: 3, 32, 32>}]} {
    %c0 = arith.constant 0 : index
    %c0_0 = arith.constant 0 : index
    %c0_1 = arith.constant 0 : index
    %0 = vector.load %arg1[%c0, %c0_0, %c0_1] : memref<3x32x32xbf16, #tpu.memory_space<vmem>>, vector<3x32x32xbf16>
    %1 = vector.shape_cast %0 : vector<3x32x32xbf16> to vector<96x32xbf16>
    %c0_2 = arith.constant 0 : index
    %c0_3 = arith.constant 0 : index
    %2 = vector.load %arg2[%c0_2, %c0_3] : memref<32x96xbf16, #tpu.memory_space<vmem>>, vector<32x96xbf16>
    %cst = arith.constant dense<0.000000e+00> : vector<96x96xf32>
    %3 = tpu.matmul %1, %2, %cst {dimension_numbers = #tpu.dot_dimension_numbers<[1], [0], [0], [1], [0, 0, 1, 1], [], []>} : vector<96x32xbf16>, vector<32x96xbf16>, vector<96x96xf32> -> vector<96x96xf32>
    %c0_4 = arith.constant 0 : index
    %c0_5 = arith.constant 0 : index
    %4 = vector.load %arg3[%c0_4, %c0_5] : memref<1x96xf32, #tpu.memory_space<vmem>>, vector<1x96xf32>
    %5 = vector.broadcast %4 : vector<1x96xf32> to vector<96x96xf32>
    %6 = arith.addf %3, %5 : vector<96x96xf32>
    %7 = arith.truncf %6 : vector<96x96xf32> to vector<96x96xbf16>
    %8 = vector.extract_strided_slice %7 {offsets = [0, 0], sizes = [96, 16], strides = [1, 1]} : vector<96x96xbf16> to vector<96x16xbf16>
    %9 = vector.extract_strided_slice %7 {offsets = [0, 16], sizes = [96, 16], strides = [1, 1]} : vector<96x96xbf16> to vector<96x16xbf16>
    %10 = vector.shape_cast %8 : vector<96x16xbf16> to vector<1x96x16xbf16>
    %11 = vector.shape_cast %9 : vector<96x16xbf16> to vector<1x96x16xbf16>
    %12 = tpu.concatenate %10, %11 in 0 : vector<1x96x16xbf16>, vector<1x96x16xbf16> -> vector<2x96x16xbf16>
    %13 = vector.shape_cast %12 : vector<2x96x16xbf16> to vector<6x32x16xbf16>
    %14 = vector.extract_strided_slice %7 {offsets = [0, 32], sizes = [96, 16], strides = [1, 1]} : vector<96x96xbf16> to vector<96x16xbf16>
    %15 = vector.extract_strided_slice %7 {offsets = [0, 48], sizes = [96, 16], strides = [1, 1]} : vector<96x96xbf16> to vector<96x16xbf16>
    %16 = vector.shape_cast %14 : vector<96x16xbf16> to vector<1x96x16xbf16>
    %17 = vector.shape_cast %15 : vector<96x16xbf16> to vector<1x96x16xbf16>
    %18 = tpu.concatenate %16, %17 in 0 : vector<1x96x16xbf16>, vector<1x96x16xbf16> -> vector<2x96x16xbf16>
    %19 = vector.shape_cast %18 : vector<2x96x16xbf16> to vector<6x32x16xbf16>
    %20 = vector.extract_strided_slice %7 {offsets = [0, 64], sizes = [96, 16], strides = [1, 1]} : vector<96x96xbf16> to vector<96x16xbf16>
    %21 = vector.extract_strided_slice %7 {offsets = [0, 80], sizes = [96, 16], strides = [1, 1]} : vector<96x96xbf16> to vector<96x16xbf16>
    %22 = vector.shape_cast %20 : vector<96x16xbf16> to vector<1x96x16xbf16>
    %23 = vector.shape_cast %21 : vector<96x16xbf16> to vector<1x96x16xbf16>
    %24 = tpu.concatenate %22, %23 in 0 : vector<1x96x16xbf16>, vector<1x96x16xbf16> -> vector<2x96x16xbf16>
    %25 = vector.shape_cast %24 : vector<2x96x16xbf16> to vector<6x32x16xbf16>
    "tpu.trace_start"() <{level = 10 : i32, message = "znd,zmd->znm"}> : () -> ()
    %cst_6 = arith.constant dense<0.000000e+00> : vector<6x32x32xf32>
    %26 = tpu.matmul %13, %19, %cst_6 {dimension_numbers = #tpu.dot_dimension_numbers<[2], [2], [1], [1], [0, 0, 0, 1, 1, 1], [0], [0]>} : vector<6x32x16xbf16>, vector<6x32x16xbf16>, vector<6x32x32xf32> -> vector<6x32x32xf32>
    "tpu.trace_stop"() : () -> ()
    %27 = vector.shape_cast %26 : vector<6x32x32xf32> to vector<2x3x32x32xf32>
    %c0_7 = arith.constant 0 : index
    %c0_8 = arith.constant 0 : index
    %c0_9 = arith.constant 0 : index
    %28 = vector.load %arg6[%c0_7, %c0_8, %c0_9] : memref<2x32x32xf32, #tpu.memory_space<vmem>>, vector<2x32x32xf32>
    %29 = vector.shape_cast %28 : vector<2x32x32xf32> to vector<2x1x32x32xf32>
    %30 = vector.broadcast %29 : vector<2x1x32x32xf32> to vector<2x3x32x32xf32>
    %31 = arith.addf %27, %30 : vector<2x3x32x32xf32>
    %32 = vector.shape_cast %31 : vector<2x3x32x32xf32> to vector<6x32x32xf32>
    %cst_10 = arith.constant dense<0xFF800000> : vector<6x32xf32>
    %33 = vector.multi_reduction <maximumf>, %32, %cst_10 [2] : vector<6x32x32xf32> to vector<6x32xf32>
    %34 = vector.shape_cast %33 : vector<6x32xf32> to vector<6x32x1xf32>
    %35 = vector.broadcast %34 : vector<6x32x1xf32> to vector<6x32x32xf32>
    %36 = arith.subf %32, %35 : vector<6x32x32xf32>
    %37 = math.exp %36 : vector<6x32x32xf32>
    %cst_11 = arith.constant dense<0.000000e+00> : vector<6x32xf32>
    %38 = vector.multi_reduction <add>, %37, %cst_11 [2] : vector<6x32x32xf32> to vector<6x32xf32>
    %39 = vector.shape_cast %38 : vector<6x32xf32> to vector<6x32x1xf32>
    %40 = tpu.reciprocal %39 {approx = true} : vector<6x32x1xf32> -> vector<6x32x1xf32>
    %41 = vector.broadcast %40 : vector<6x32x1xf32> to vector<6x32x32xf32>
    %42 = arith.mulf %37, %41 : vector<6x32x32xf32>
    %43 = arith.truncf %42 : vector<6x32x32xf32> to vector<6x32x32xbf16>
    "tpu.trace_start"() <{level = 10 : i32, message = "znm,zmd->znd"}> : () -> ()
    %cst_12 = arith.constant dense<0.000000e+00> : vector<6x32x16xf32>
    %44 = tpu.matmul %43, %25, %cst_12 {dimension_numbers = #tpu.dot_dimension_numbers<[2], [1], [1], [2], [0, 0, 0, 1, 1, 2], [0], [0]>} : vector<6x32x32xbf16>, vector<6x32x16xbf16>, vector<6x32x16xf32> -> vector<6x32x16xf32>
    "tpu.trace_stop"() : () -> ()
    %45 = vector.shape_cast %44 : vector<6x32x16xf32> to vector<2x96x16xf32>
    %46 = arith.truncf %45 : vector<2x96x16xf32> to vector<2x96x16xbf16>
    %c0_13 = arith.constant 0 : index
    %c0_14 = arith.constant 0 : index
    %c0_15 = arith.constant 0 : index
    %47 = vector.load %arg4[%c0_13, %c0_14, %c0_15] : memref<2x16x32xbf16, #tpu.memory_space<vmem>>, vector<2x16x32xbf16>
    "tpu.trace_start"() <{level = 10 : i32, message = "hmd,hdc->hmc"}> : () -> ()
    %cst_16 = arith.constant dense<0.000000e+00> : vector<2x96x32xf32>
    %48 = tpu.matmul %46, %47, %cst_16 {dimension_numbers = #tpu.dot_dimension_numbers<[2], [1], [1], [2], [0, 0, 0, 1, 1, 2], [0], [0]>} : vector<2x96x16xbf16>, vector<2x16x32xbf16>, vector<2x96x32xf32> -> vector<2x96x32xf32>
    "tpu.trace_stop"() : () -> ()
    %cst_17 = arith.constant dense<0.000000e+00> : vector<96x32xf32>
    %49 = vector.multi_reduction <add>, %48, %cst_17 [0] : vector<2x96x32xf32> to vector<96x32xf32>
    %c0_18 = arith.constant 0 : index
    %c0_19 = arith.constant 0 : index
    %50 = vector.load %arg5[%c0_18, %c0_19] : memref<1x32xf32, #tpu.memory_space<vmem>>, vector<1x32xf32>
    %51 = vector.broadcast %50 : vector<1x32xf32> to vector<96x32xf32>
    %52 = arith.addf %49, %51 : vector<96x32xf32>
    %53 = vector.shape_cast %52 : vector<96x32xf32> to vector<3x32x32xf32>
    %c0_20 = arith.constant 0 : index
    %c0_21 = arith.constant 0 : index
    %c0_22 = arith.constant 0 : index
    %54 = vector.load %arg7[%c0_20, %c0_21, %c0_22] : memref<3x32x32xf32, #tpu.memory_space<vmem>>, vector<3x32x32xf32>
    tpu.vector_store %arg7[%c0_20, %c0_21, %c0_22], %53 {strides = array<i32>} : memref<3x32x32xf32, #tpu.memory_space<vmem>>, vector<3x32x32xf32>,
    return
  }
  func.func @transform_0(%arg0: i32) -> (i32, i32, i32) {
    %c0_i32 = arith.constant 0 : i32
    %c0_i32_0 = arith.constant 0 : i32
    %c0_i32_1 = arith.constant 0 : i32
    return %arg0, %c0_i32, %c0_i32_0 : i32, i32, i32
  }
  func.func @transform_1(%arg0: i32) -> (i32, i32) {
    %c0_i32 = arith.constant 0 : i32
    %c0_i32_0 = arith.constant 0 : i32
    %c0_i32_1 = arith.constant 0 : i32
    return %c0_i32, %c0_i32_0 : i32, i32
  }
  func.func @transform_2(%arg0: i32) -> (i32, i32) {
    %c0_i32 = arith.constant 0 : i32
    %c0_i32_0 = arith.constant 0 : i32
    %c0_i32_1 = arith.constant 0 : i32
    return %c0_i32, %c0_i32_0 : i32, i32
  }
  func.func @transform_3(%arg0: i32) -> (i32, i32, i32) {
    %c0_i32 = arith.constant 0 : i32
    %c0_i32_0 = arith.constant 0 : i32
    %c0_i32_1 = arith.constant 0 : i32
    %c0_i32_2 = arith.constant 0 : i32
    return %c0_i32, %c0_i32_0, %c0_i32_1 : i32, i32, i32
  }
  func.func @transform_4(%arg0: i32) -> (i32, i32) {
    %c0_i32 = arith.constant 0 : i32
    %c0_i32_0 = arith.constant 0 : i32
    %c0_i32_1 = arith.constant 0 : i32
    return %c0_i32, %c0_i32_0 : i32, i32
  }
  func.func @transform_5(%arg0: i32) -> (i32, i32, i32) {
    %c0_i32 = arith.constant 0 : i32
    %c0_i32_0 = arith.constant 0 : i32
    %c0_i32_1 = arith.constant 0 : i32
    %c0_i32_2 = arith.constant 0 : i32
    return %c0_i32, %c0_i32_0, %c0_i32_1 : i32, i32, i32
  }
  func.func @transform_6(%arg0: i32) -> (i32, i32, i32) {
    %c0_i32 = arith.constant 0 : i32
    %c0_i32_0 = arith.constant 0 : i32
    %c0_i32_1 = arith.constant 0 : i32
    return %arg0, %c0_i32, %c0_i32_0 : i32, i32, i32
  }
}

</mosaic_0001>

<bundles_post_ra>
// kernel: tpu_custom_call.1
= control target key start
LH: loop header
LB: loop body
LE: loop exit
PB: predicated region body
PF: predicated region fallthrough
CT: control target
= control target key end

     0   :  { %11 = vsyncpa [#allocation3], 0  ;;  %s3364_s0 = inlined_call_operand.hbm [shape: bf16[6,32,32], index: 0, kind: input, shape index: {}]   ;;  %s3365_s1 = inlined_call_operand.hbm [shape: bf16[32,96], index: 1, kind: input, shape index: {}]   ;;  %s3366_s2 = inlined_call_operand.vmem [shape: f32[1,96], index: 2, kind: input, shape index: {}]   ;;  %s3367_s3 = inlined_call_operand.hbm [shape: bf16[2,16,32], index: 3, kind: input, shape index: {}]   ;;  %s3368_s4 = inlined_call_operand.vmem [shape: f32[1,32], index: 4, kind: input, shape index: {}]   ;;  %s3369_s5 = inlined_call_operand.hbm [shape: f32[2,32,32], index: 5, kind: input, shape index: {}]   ;;  %s3370_s6 = inlined_call_operand.hbm [shape: f32[6,32,32], index: 6, kind: output, shape index: {}]  }
   0x1   :  { %13 = vsyncpa [#allocation3 + $0x1], 0 }
   0x2   :  { %14 = vsyncpa [#allocation6], 0 }
   0x3   :  { %15 = vsyncpa [#allocation9], 0 }
   0x4   :  { %16 = vsyncpa [#allocation4], 0 }
   0x5   :  { %18 = vsyncpa [#allocation4 + $0x1], 0  ;;  %s2704_s21 = smov 0   ;;  %s2706_s22 = smov 0  }
   0x6   :  { %s2708_s23 = smov 0   ;;  %s2710_s24 = smov 0  }
   0x7 LB: > { %s2725_s25 = sadd.s32 4294967295, %s2653_s24   ;;  %s1982_s26 = sadd.s32 4294967294, %s2653_s24   ;;  %s2653_s24 = sphi %s2710_s24, %s3397_s24   ;;  %s2649_s23 = sphi %s2708_s23, %s3396_s23   ;;  %s2645_s22 = sphi %s2706_s22, %s3395_s22   ;;  %s2641_s21 = sphi %s2704_s21, %s3394_s21  }
   0x8   : > { %p44_p0 = scmp.ne.s32.totalorder %s2645_s22, %s2641_s21  ;;  %p3371_p1 = scmp.eq.s32.totalorder %s2725_s25, 0 }
   0x9   : > { %p173_p2 = scmp.eq.s32.totalorder %s2725_s25, 1  ;;  %p179_p3 = scmp.eq.s32.totalorder %s1982_s26, 1 }
   0xa   : > { %p2734_p4 = por %p3371_p1, %p44_p0  ;;  %p1983_p5 = scmp.ge.s32.totalorder %s2653_s24, 1 }
   0xb   : > { %p2739_p6 = por %p179_p3, %p44_p0  ;;  %p186_p7 = scmp.lt.s32.totalorder %s2653_s24, 3 }
   0xc   : > { %s3377_s27 = scalar_select %p2734_p4, 1, 0 }
   0xd   : > { %s3378_s28 = scalar_select %p2739_p6, 1, 0 }
   0xe   : > { %p2744_p8 = pnand %p1983_p5, %p186_p7  ;;  %s2655_s30 = smov [#allocation5]  }
   0xf   : > { %s198_s7 = sshll.u32 %s2655_s30, 4  ;;  %s2656_s9 = smov [#allocation7]   ;;  %s199_s7 = int_to_ptr.vmem [resolvable:$true] %s198_s7 }
  0x10   : > { %s3379_s29 = scalar_select %p2744_p8, 1, 0 }
  0x11   : > { %p2299_p9 = pneg %p2744_p8  ;;  %s214_s10 = sshll.u32 %s2656_s9, 4  ;;  %s215_s10 = int_to_ptr.vmem [resolvable:$true] %s214_s10 }
  0x12   : > { %s2657_s11 = smov [#allocation8]   ;;  %s2486_s13 = scalar_lea.vmem %s199_s7, 256 }
  0x13   : > { %p2753_p11 = pnand %p2299_p9, %p3371_p1  ;;  %s230_s12 = sshll.u32 %s2657_s11, 4  ;;  %s231_s12 = int_to_ptr.vmem [resolvable:$true] %s230_s12 }
  0x14   : > { %p2487_p13 = scmp.ne.s32.totalorder %s199_s7, %s2486_s13  ;;  %p2494_p5 = scmp.lt.s32.totalorder %s199_s7, %s199_s7 }
  0x15   : > { %p2477_p12 = pneg %p2753_p11  ;;  %p2495_p7 = scmp.lt.s32.totalorder %s2486_s13, %s2486_s13 }
  0x17   : > { %p2489_p0 = pnand %p2487_p13, %p2477_p12  ;;  %p2496_p9 = por %p2495_p7, %p2494_p5 }
  0x19   : > { %p2490_p3 = pneg %p2489_p0 }
  0x1b   : > { %p2497_p10 = pnand %p2496_p9, %p2490_p3 }
  0x1d   : > { %2500 = shalt.err (!%p2497_p10)
}
  0x1e   : > { %s3372_s14 = smov 64   ;;  %s3373_s15 = smov 4  }
  0x1f   : > { %2302 = dma.hbm_to_vmem [thread:$0]  (!%p2753_p11), %s3365_s1, 256, %s199_s7, [#allocation6], %s3372_s14, %s3372_s14, %s3373_s15  }
  0x20   : > { %s2512_s18 = scalar_lea.vmem %s215_s10, 256  ;;  %p2520_p3 = scmp.lt.s32.totalorder %s215_s10, %s215_s10 }
  0x21   : > { %p2513_p13 = scmp.ne.s32.totalorder %s215_s10, %s2512_s18  ;;  %p2521_p10 = scmp.lt.s32.totalorder %s2512_s18, %s2512_s18 }
  0x23   : > { %p2515_p0 = pnand %p2513_p13, %p2477_p12  ;;  %p2522_p7 = por %p2521_p10, %p2520_p3 }
  0x25   : > { %p2516_p5 = pneg %p2515_p0 }
  0x27   : > { %p2523_p9 = pnand %p2522_p7, %p2516_p5 }
  0x29   : > { %2526 = shalt.err (!%p2523_p9)
}
  0x2a   : > { %2305 = dma.hbm_to_vmem [thread:$0]  (!%p2753_p11), %s3367_s3, 256, %s215_s10, [#allocation6], %s3372_s14, %s3372_s14, %s3373_s15  }
  0x2b   : > { %s2538_s26 = scalar_lea.vmem %s231_s12, 1024  ;;  %p2546_p3 = scmp.lt.s32.totalorder %s231_s12, %s231_s12 }
  0x2c   : > { %p2539_p1 = scmp.ne.s32.totalorder %s231_s12, %s2538_s26  ;;  %p2547_p5 = scmp.lt.s32.totalorder %s2538_s26, %s2538_s26 }
  0x2e   : > { %p2541_p13 = pnand %p2539_p1, %p2477_p12  ;;  %p2548_p10 = por %p2547_p5, %p2546_p3 }
  0x30   : > { %p2542_p0 = pneg %p2541_p13 }
  0x32   : > { %p2549_p7 = pnand %p2548_p10, %p2542_p0 }
  0x34   : > { %2552 = shalt.err (!%p2549_p7)
}
  0x35   : > { %s2660_s30 = smov 128   ;;  %s2661_s7 = smov 8  }
  0x36   : > { %2308 = dma.hbm_to_vmem [thread:$0]  (!%p2753_p11), %s3369_s5, 1024, %s231_s12, [#allocation9], %s2660_s30, %s2660_s30, %s2661_s7  }
  0x37   : > { %s2790_s11 = sadd.s32 1, %s2653_s24   ;;  %s31_s16 = sadd.s32 1, %s2649_s23 }
  0x38   : > { %s28_s13 = ssub.s32 %s2653_s24, %s2790_s11  ;;  %p38_p12 = scmp.ne.s32.totalorder %s2649_s23, %s2645_s22 }
  0x39   : > { %p29_p1 = scmp.eq.s32.totalorder %s28_s13, 0  ;;  %p39_p9 = scmp.eq.s32.totalorder %s2653_s24, 0 }
  0x3a   : > { %p2320_p13 = scmp.lt.s32.totalorder %s2653_s24, 2  ;;  %p2804_p3 = por %p173_p2, %p38_p12 }
  0x3b   : > { %s2800_s17 = scalar_select %p29_p1, %s2649_s23, %s31_s16  }
  0x3c   : > { %p40_p0 = por %p39_p9, %p38_p12  ;;  %s244_s8 = sand.u32 1, %s2649_s23  }
  0x3d   : > { %s3381_s18 = scalar_select %p2804_p3, 1, 0 }
  0x3e   : > { %s2056_s19 = smul.u32 768, %s2653_s24  ;;  %p2810_p11 = pnand %p2320_p13, %p40_p0 }
  0x3f   : > { %s2280_s12 = smul.u32 48, %s244_s8  ;;  %s2821_s13 = scalar_lea.sflag [#allocation3], %s244_s8 }
  0x40   : > { %s2817_s7 = scalar_lea.hbm %s3364_s0, %s2056_s19  ;;  %p2555_p5 = pneg %p2810_p11 }
  0x41   : > { %s248_s9 = scalar_lea.vmem [#allocation2], %s2280_s12  ;;  %s2553_s16 = scalar_lea.hbm %s2817_s7, 768 }
  0x42   : > { %s256_s10 = sshll.u32 %s248_s9, 4  ;;  %p2554_p2 = scmp.ne.s32.totalorder %s2817_s7, %s2553_s16  ;;  %s2819_s10 = int_to_ptr.vmem [resolvable:$true] %s256_s10 }
  0x43   : > { %s2558_s19 = scalar_lea.hbm %s3364_s0, 1536  ;;  %p2559_p1 = scmp.lt.s32.totalorder %s2817_s7, %s3364_s0 }
  0x44   : > { %p2556_p10 = pnand %p2555_p5, %p2554_p2  ;;  %p2560_p12 = scmp.lt.s32.totalorder %s2558_s19, %s2553_s16 }
  0x46   : > { %p2557_p7 = pneg %p2556_p10  ;;  %p2561_p9 = por %p2560_p12, %p2559_p1 }
  0x48   : > { %p2562_p13 = pnand %p2561_p9, %p2557_p7 }
  0x4a   : > { %2565 = shalt.err (!%p2562_p13)
}
  0x4b   : > { %s2566_s8 = scalar_lea.vmem %s2819_s10, 768  ;;  %s2662_s12 = smov [#allocation2]  }
  0x4c   : > { %p2567_p0 = scmp.ne.s32.totalorder %s2819_s10, %s2566_s8  ;;  %s2571_s9 = sshll.u32 %s2662_s12, 4  ;;  %s2572_s9 = int_to_ptr.vmem [resolvable:$false] %s2571_s9 }
  0x4d   : > { %s2573_s14 = scalar_lea.vmem %s2572_s9, 1536  ;;  %p2574_p10 = scmp.lt.s32.totalorder %s2819_s10, %s2572_s9 }
  0x4e   : > { %p2569_p6 = pnand %p2567_p0, %p2555_p5  ;;  %p2575_p3 = scmp.lt.s32.totalorder %s2573_s14, %s2566_s8 }
  0x50   : > { %p2570_p2 = pneg %p2569_p6  ;;  %p2576_p4 = por %p2575_p3, %p2574_p10 }
  0x52   : > { %p2577_p8 = pnand %p2576_p4, %p2570_p2 }
  0x54   : > { %2580 = shalt.err (!%p2577_p8)
}
  0x55   : > { %s3383_s15 = smov 4   ;;  %s3384_s16 = smov 64  }
  0x56   : > { %2312 = dma.hbm_to_vmem [thread:$0]  (!%p2810_p11), %s2817_s7, 768, %s2819_s10, %s2821_s13, %s3384_s16, %s3384_s16, %s3383_s15  }
  0x57   : > { %p3385_p6 = scmp.ne.s32.totalorder %s3379_s29, 0 }
  0x58   : > { %s2848_s26 = sand.u32 (!%p3385_p6), 1, %s2645_s22   ;;  %p3386_p4 = scmp.ne.s32.totalorder (!%p3385_p6), %s3377_s27, 0 }
  0x59   : > { %268 = sbr.rel (%p3385_p6) target bundleno = 1521 (0x5f1), region = 44  ;;  %s271_s30 = scalar_lea.sflag (!%p3385_p6), [#allocation3], %s2848_s26 }
  0x5a   : > { %s2281_s19 = smul.u32 (!%p3385_p6), 48, %s2848_s26 }
  0x5c   : > { %s274_s8 = scalar_lea.vmem (!%p3385_p6), [#allocation2], %s2281_s19 }
  0x5e   : > { %2624 = dma.done.wait (%p3386_p4), %s271_s30, 768  }
  0x5f   : > { %2626 = vsyncadd (%p3386_p4), %s271_s30, 4294966528  ;;  %p3387_p8 = scmp.eq.s32.totalorder %s2725_s25, 0 }
  0x61   : > { %2628 = dma.done.wait (%p3387_p8), [#allocation6], 512   ;;  %p3388_p3 = pmov %p3387_p8 }
  0x63   : > { %2630 = vsyncadd (%p3388_p3), [#allocation6], 4294966784  ;;  %p3389_p11 = pmov %p3388_p3 }
  0x64   : > { %p3390_p5 = pmov %p3388_p3 }
  0x65   : > { %2632 = dma.done.wait (%p3389_p11), [#allocation9], 1024  }
  0x66   : > { %2634 = vsyncadd (%p3390_p5), [#allocation9], 4294966272  ;;  %v2369_v0 = vld [vmem:[#allocation5 + $0x8] sm:$0xff]   ;;  %v2370_v1 = vld [vmem:[#allocation5] sm:$0xff]   ;;  %vm383_vm0 = vcmask 261120   ;;  %vm511_vm1 = vcmask 130048  }
  0x67   : > { %2128 = vmatprep.subr.bf16.mxu0 %v2369_v0  ;;  %v2371_v2 = vld [vmem:[%s274_s8] sm:$0xff]   ;;  %v2372_v3 = vld [vmem:[%s274_s8 + $0x8] sm:$0xff]   ;;  %v2373_v4 = vld [vmem:[%s274_s8 + $0x10] sm:$0xff]   ;;  %s2663_s20 = smov 112   ;;  %s2664_s7 = smov 96  }
  0x68   : > { %2129 = vmatpush3.bf16.msra.mxu0 %v2369_v0  ;;  %2132 = vmatprep.mubr.msk.bf16.mxu0 %vm383_vm0, %v2371_v2  ;;  %v2374_v5 = vld [vmem:[%s274_s8 + $0x18] sm:$0xff]   ;;  %v2375_v6 = vld [vmem:[%s274_s8 + $0x20] sm:$0xff]   ;;  %v2376_v7 = vld [vmem:[%s274_s8 + $0x28] sm:$0xff]   ;;  %s2665_s10 = smov 64   ;;  %s2282_s13 = smul.u32 96, %s2848_s26 }
  0x69   : > { %2130 = vmatprep.subr.bf16.mxu0 %v2370_v1  ;;  %v1994_v9 = vld [vmem:[%s3366_s2] ss:$0 sm:$0xff]  ;;  %s2057_s15 = smul.u32 1536, %s2725_s25  ;;  %s1866_s8 = scalar_lea.sflag [#allocation4], %s2848_s26 }
  0x6a   : > { %s3259_s14 = scalar_lea.vmem [#allocation10], %s2282_s13  ;;  %p3391_p1 = scmp.ne.s32.totalorder %s3381_s18, 0 }
  0x6b   : > { %s1880_s16 = sshll.u32 %s3259_s14, 4  ;;  %s3314_s30 = scalar_lea.hbm %s3370_s6, %s2057_s15  ;;  %s3316_s16 = int_to_ptr.vmem [resolvable:$true] %s1880_s16 }
  0x6c   : > { %2131 = vmatpush3.bf16.msra.mxu0 %v2370_v1  ;;  %s2581_s27 = scalar_lea.vmem %s3316_s16, 1536  ;;  %s2666_s29 = smov [#allocation10]  }
  0x6d   : > { %p2582_p7 = scmp.ne.s32.totalorder %s3316_s16, %s2581_s27 }
  0x6f   : > { %2133 = vmatmul.mubr.msk.bf16.vlgmr.msra.gmra.mxu0 %vm383_vm0, %v2372_v3  ;;  %p2583_p12 = pnand %p2582_p7, %p3391_p1 }
  0x70   : > { %2136 = vmatprep.mubr.msk.bf16.mxu0 %vm383_vm0, %v2373_v4 }
  0x71   : > { %p2584_p9 = pneg %p2583_p12 }
  0x77   : > { %2137 = vmatmul.mubr.msk.bf16.gmra.mxu0 %vm383_vm0, %v2374_v5 }
  0x78   : > { %2140 = vmatprep.mubr.msk.bf16.mxu0 %vm383_vm0, %v2375_v6 }
  0x7f   : > { %2141 = vmatmul.mubr.msk.bf16.gmra.mxu0 %vm383_vm0, %v2376_v7 }
 0x12f   : > { %v2134_v8 = vpop.f32.mrf.mxu0 }
 0x130   : > { %v445_v12 = vadd.f32 %v2134_v8, %v1994_v9 }
 0x131   : > { %v436_v10 = vpop.f32.mrf.mxu0 }
 0x132   : > { %v437_v15 = vadd.f32 %v1994_v9, %v436_v10 }
 0x133   : > { %v2135_v11 = vpop.f32.mrf.mxu0 }
 0x134   : > { %v448_v13 = vadd.f32 %v2135_v11, %v1994_v9 }
 0x135   : > { %v439_v14 = vpop.f32.mrf.mxu0 }
 0x136   : > { %v2873_v16 = vpack.c.bf16 %v448_v13, %v445_v12  ;;  %v440_v17 = vadd.f32 %v1994_v9, %v439_v14  ;;  %v900_v12 = vld [vmem:[#allocation8 + $0x10] sm:$0xff]  ;;  %v898_v14 = vld [vmem:[#allocation8] sm:$0xff] }
 0x137   : > { %v2138_v18 = vpop.f32.mrf.mxu0 }
 0x138   : > { %v483_v19 = vpack.c.bf16 %v440_v17, %v437_v15  ;;  %497 = vrot.lane.b32.xlu0 %v2873_v16, %s2663_s20  ;;  %v461_v21 = vadd.f32 %v2138_v18, %v1994_v9 }
 0x139   : > { %v452_v20 = vpop.f32.mrf.mxu0 }
 0x13a   : > { %2148 = vmatprep.mubr.msk.bf16.mxu1 %vm511_vm1, %v483_v19  ;;  %v453_v25 = vadd.f32 %v1994_v9, %v452_v20 }
 0x13b   : > { %v2139_v22 = vpop.f32.mrf.mxu0 }
 0x13c   : > { %v464_v23 = vadd.f32 %v2139_v22, %v1994_v9  ;;  %495 = vrot.lane.b32.xlu0 %v483_v19, %s2663_s20  ;;  %v899_v22 = vld [vmem:[#allocation8 + $0x8] sm:$0xff] }
 0x13d   : > { %v455_v24 = vpop.f32.mrf.mxu0 }
 0x13e   : > { %v2877_v26 = vpack.c.bf16 %v464_v23, %v461_v21  ;;  %v456_v27 = vadd.f32 %v1994_v9, %v455_v24  ;;  %v901_v21 = vld [vmem:[#allocation8 + $0x18] sm:$0xff] }
 0x13f   : > { %v2142_v28 = vpop.f32.mrf.mxu0 }
 0x140   : > { %v485_v29 = vpack.c.bf16 %v456_v27, %v453_v25  ;;  %501 = vrot.lane.b32.xlu1 %v2877_v26, %s2663_s20  ;;  %v477_v31 = vadd.f32 %v2142_v28, %v1994_v9 }
 0x141   : > { %v468_v30 = vpop.f32.mrf.mxu0 }
 0x142   : > { %2156 = vmatprep.mubr.msk.bf16.mxu0 %vm511_vm1, %v485_v29  ;;  %v469_v33 = vadd.f32 %v1994_v9, %v468_v30 }
 0x143   : > { %v2143_v32 = vpop.f32.mrf.mxu0 }
 0x144   : > { %v480_v34 = vadd.f32 %v2143_v32, %v1994_v9  ;;  %499 = vrot.lane.b32.xlu1 %v485_v29, %s2663_s20 }
 0x145   : > { %v471_v35 = vpop.f32.mrf.mxu0 }
 0x146   : > { %v488_v36 = vpack.c.bf16 %v480_v34, %v477_v31  ;;  %v472_v37 = vadd.f32 %v1994_v9, %v471_v35 }
 0x148   : > { %v487_v38 = vpack.c.bf16 %v472_v37, %v469_v33  ;;  %505 = vrot.lane.b32.xlu0 %v488_v36, %s2663_s20 }
 0x14a   : > { %503 = vrot.lane.b32.xlu1 %v487_v38, %s2663_s20  ;;  %s2585_s20 = sshll.u32 %s2666_s29, 4  ;;  %s2586_s20 = int_to_ptr.vmem [resolvable:$false] %s2585_s20 }
 0x14b   : > { %p2588_p13 = scmp.lt.s32.totalorder %s3316_s16, %s2586_s20 }
 0x14c   : > { %509 = vrot.lane.b32.xlu0 %v2873_v16, %s2664_s7 }
 0x14e   : > { %507 = vrot.lane.b32.xlu1 %v483_v19, %s2664_s7 }
 0x150   : > { %575 = vrot.lane.b32.xlu0 %v2877_v26, %s2664_s7 }
 0x152   : > { %573 = vrot.lane.b32.xlu1 %v485_v29, %s2664_s7 }
 0x154   : > { %640 = vrot.lane.b32.xlu0 %v488_v36, %s2664_s7 }
 0x156   : > { %638 = vrot.lane.b32.xlu1 %v487_v38, %s2664_s7 }
 0x1aa   : > { %v2883_v39 = vpop.permute.xlu0 %497 }
 0x1ab   : > { %705 = vrot.lane.b32.xlu0 %v2883_v39, %s2664_s7 }
 0x1ae   : > { %v496_v40 = vpop.permute.xlu0 %495 }
 0x1af   : > { %703 = vrot.lane.b32.xlu1 %v496_v40, %s2664_s7 }
 0x1b2   : > { %v2886_v41 = vpop.permute.xlu1 %501 }
 0x1b3   : > { %770 = vrot.lane.b32.xlu0 %v2886_v41, %s2664_s7 }
 0x1b6   : > { %v2889_v42 = vpop.permute.xlu1 %499 }
 0x1b7   : > { %768 = vrot.lane.b32.xlu1 %v2889_v42, %s2664_s7 }
 0x1ba   : > { %v2892_v43 = vpop.permute.xlu0 %505 }
 0x1bb   : > { %835 = vrot.lane.b32.xlu0 %v2892_v43, %s2664_s7 }
 0x1bc   : > { %v2895_v44 = vpop.permute.xlu1 %503 }
 0x1bd   : > { %833 = vrot.lane.b32.xlu1 %v2895_v44, %s2664_s7  ;;  %s2587_s7 = scalar_lea.vmem %s2586_s20, 3072 }
 0x1be   : > { %v510_v45 = vpop.permute.xlu0 %509  ;;  %p2589_p0 = scmp.lt.s32.totalorder %s2587_s7, %s2581_s27 }
 0x1bf   : > { %1269 = vrot.lane.b32.xlu0 %v2877_v26, %s2665_s10  ;;  %2268 = vmatprep.subr.msk.bf16.mxu1 %vm511_vm1, %v510_v45  ;;  %v522_v46 = vsel %vm511_vm1, %v510_v45, 0 }
 0x1c0   : > { %v508_v47 = vpop.permute.xlu1 %507  ;;  %2145 = vmatpush3.bf16.xpose.msra.mxu1 %v522_v46  ;;  %p2590_p2 = por %p2589_p0, %p2588_p13 }
 0x1c1   : > { %1208 = vrot.lane.b32.xlu1 %v2873_v16, %s2665_s10  ;;  %2269 = vmatprep.subr.msk.bf16.mxu1 %vm511_vm1, %v508_v47  ;;  %v519_v51 = vsel %vm511_vm1, %v508_v47, 0 }
 0x1c2   : > { %v576_v48 = vpop.permute.xlu0 %575  ;;  %p2591_p10 = pnand %p2590_p2, %p2584_p9 }
 0x1c3   : > { %v587_v49 = vsel %vm511_vm1, %v576_v48, 0  ;;  %1330 = vrot.lane.b32.xlu0 %v488_v36, %s2665_s10  ;;  %2270 = vmatprep.subr.msk.bf16.mxu0 %vm511_vm1, %v576_v48 }
 0x1c4   : > { %v574_v50 = vpop.permute.xlu1 %573  ;;  %2153 = vmatpush3.bf16.xpose.msra.mxu0 %v587_v49 }
 0x1c5   : > { %1206 = vrot.lane.b32.xlu1 %v483_v19, %s2665_s10  ;;  %2271 = vmatprep.subr.msk.bf16.mxu0 %vm511_vm1, %v574_v50  ;;  %v584_v53 = vsel %vm511_vm1, %v574_v50, 0 }
 0x1c6   : > { %v641_v52 = vpop.permute.xlu0 %640 }
 0x1c7   : > { %v652_v54 = vsel %vm511_vm1, %v641_v52, 0 }
 0x1c8   : > { %2147 = vmatpush3.bf16.xpose.msra.mxu1 %v519_v51  ;;  %v639_v55 = vpop.permute.xlu1 %638 }
 0x1c9   : > { %1267 = vrot.lane.b32.xlu1 %v485_v29, %s2665_s10  ;;  %2272 = vmatprep.subr.msk.bf16.mxu1 %vm511_vm1, %v641_v52  ;;  %v649_v56 = vsel %vm511_vm1, %v639_v55, 0 }
 0x1cc   : > { %2155 = vmatpush3.bf16.xpose.msra.mxu0 %v584_v53 }
 0x1cd   : > { %1391 = vrot.lane.b32.xlu1 %v2883_v39, %s2665_s10 }
 0x1cf   : > { %2149 = vmatmul.mubr.msk.bf16.vlgmr.msra.gmra.mxu1 %vm511_vm1, %v2873_v16 }
 0x1d0   : > { %2161 = vmatpush3.bf16.xpose.msra.mxu1 %v652_v54  ;;  %2164 = vmatprep.mubr.msk.bf16.mxu1 %vm511_vm1, %v487_v38 }
 0x1d1   : > { %1328 = vrot.lane.b32.xlu1 %v487_v38, %s2665_s10  ;;  %2273 = vmatprep.subr.msk.bf16.mxu1 %vm511_vm1, %v639_v55 }
 0x1d3   : > { %2157 = vmatmul.mubr.msk.bf16.vlgmr.msra.gmra.mxu0 %vm511_vm1, %v2877_v26 }
 0x1d4   : > { %2172 = vmatprep.mubr.msk.bf16.mxu0 %vm511_vm1, %v496_v40 }
 0x1d5   : > { %1389 = vrot.lane.b32.xlu1 %v496_v40, %s2665_s10 }
 0x1d8   : > { %2163 = vmatpush3.bf16.xpose.msra.mxu1 %v649_v56  ;;  %v904_v56 = vld [vmem:[#allocation8 + $0x30] sm:$0xff] }
 0x1df   : > { %2165 = vmatmul.mubr.msk.bf16.vlgmr.msra.gmra.mxu1 %vm511_vm1, %v488_v36 }
 0x1e0   : > { %2180 = vmatprep.mubr.msk.bf16.mxu1 %vm511_vm1, %v2889_v42 }
 0x21d   : > { %v706_v57 = vpop.permute.xlu0 %705 }
 0x21e   : > { %v717_v58 = vsel %vm511_vm1, %v706_v57, 0  ;;  %2274 = vmatprep.subr.msk.bf16.mxu0 %vm511_vm1, %v706_v57 }
 0x21f   : > { %2169 = vmatpush3.bf16.xpose.msra.mxu0 %v717_v58  ;;  %v902_v58 = vld [vmem:[#allocation8 + $0x20] sm:$0xff] }
 0x221   : > { %v704_v59 = vpop.permute.xlu1 %703 }
 0x222   : > { %2275 = vmatprep.subr.msk.bf16.mxu0 %vm511_vm1, %v704_v59  ;;  %v714_v61 = vsel %vm511_vm1, %v704_v59, 0 }
 0x225   : > { %v771_v60 = vpop.permute.xlu0 %770 }
 0x226   : > { %v782_v62 = vsel %vm511_vm1, %v771_v60, 0  ;;  %2276 = vmatprep.subr.msk.bf16.mxu1 %vm511_vm1, %v771_v60 }
 0x227   : > { %2171 = vmatpush3.bf16.xpose.msra.mxu0 %v714_v61  ;;  %2177 = vmatpush3.bf16.xpose.msra.mxu1 %v782_v62  ;;  %v905_v61 = vld [vmem:[#allocation8 + $0x38] sm:$0xff] }
 0x229   : > { %v769_v63 = vpop.permute.xlu1 %768 }
 0x22a   : > { %2277 = vmatprep.subr.msk.bf16.mxu1 %vm511_vm1, %v769_v63  ;;  %v779_v1 = vsel %vm511_vm1, %v769_v63, 0 }
 0x22d   : > { %v836_v0 = vpop.permute.xlu0 %835 }
 0x22e   : > { %v847_v2 = vsel %vm511_vm1, %v836_v0, 0  ;;  %2173 = vmatmul.mubr.msk.bf16.vlgmr.msra.gmra.mxu0 %vm511_vm1, %v2883_v39  ;;  %2278 = vmatprep.subr.msk.bf16.mxu0 %vm511_vm1, %v836_v0 }
 0x22f   : > { %v834_v3 = vpop.permute.xlu1 %833  ;;  %2179 = vmatpush3.bf16.xpose.msra.mxu1 %v779_v1  ;;  %2185 = vmatpush3.bf16.xpose.msra.mxu0 %v847_v2  ;;  %v903_v1 = vld [vmem:[#allocation8 + $0x28] sm:$0xff] }
 0x230   : > { %2188 = vmatprep.mubr.msk.bf16.mxu0 %vm511_vm1, %v2895_v44  ;;  %2279 = vmatprep.subr.msk.bf16.mxu0 %vm511_vm1, %v834_v3  ;;  %v844_v6 = vsel %vm511_vm1, %v834_v3, 0 }
 0x231   : > { %v2945_v4 = vpop.permute.xlu0 %1269 }
 0x233   : > { %v1209_v5 = vpop.permute.xlu1 %1208 }
 0x234   : > { %2192 = vmatprep.subr.bf16.mxu1 %v1209_v5 }
 0x235   : > { %v1331_v7 = vpop.permute.xlu0 %1330 }
 0x236   : > { %2181 = vmatmul.mubr.msk.bf16.vlgmr.msra.gmra.mxu1 %vm511_vm1, %v2886_v41 }
 0x237   : > { %v1207_v8 = vpop.permute.xlu1 %1206  ;;  %2187 = vmatpush3.bf16.xpose.msra.mxu0 %v844_v6  ;;  %2193 = vmatpush3.bf16.msra.mxu1 %v1209_v5 }
 0x238   : > { %2194 = vmatprep.subr.bf16.mxu1 %v1207_v8  ;;  %2208 = vmatprep.subr.bf16.mxu0 %v1331_v7 }
 0x23b   : > { %v2950_v9 = vpop.permute.xlu1 %1267  ;;  %2195 = vmatpush3.bf16.msra.mxu1 %v1207_v8 }
 0x23c   : > { %2200 = vmatprep.subr.bf16.mxu1 %v2945_v4 }
 0x23e   : > { %2189 = vmatmul.mubr.msk.bf16.vlgmr.msra.gmra.mxu0 %vm511_vm1, %v2892_v43 }
 0x23f   : > { %v2955_v10 = vpop.permute.xlu1 %1391  ;;  %2209 = vmatpush3.bf16.msra.mxu0 %v1331_v7 }
 0x243   : > { %v1329_v11 = vpop.permute.xlu1 %1328 }
 0x244   : > { %2210 = vmatprep.subr.bf16.mxu0 %v1329_v11 }
 0x245   : > { %2211 = vmatpush3.bf16.msra.mxu0 %v1329_v11 }
 0x28f   : > { %v2150_v13 = vpop.f32.mrf.mxu1 }
 0x290   : > { %v2957_v15 = vadd.f32 %v2150_v13, %v900_v12 }
 0x291   : > { %v558_v16 = vpop.f32.mrf.mxu1 }
 0x292   : > { %v2959_v17 = vadd.f32 %v898_v14, %v558_v16  ;;  %v936_v18 = vsel %vm383_vm0, %v2957_v15, -inf }
 0x293   : > { %v2158_v19 = vpop.f32.mrf.mxu0  ;;  %937 = vmax.xlane.f32.xlu0 %v936_v18  ;;  %v2151_v20 = vpop.f32.mrf.mxu1 }
 0x294   : > { %v2963_v25 = vadd.f32 %v2151_v20, %v901_v21  ;;  %v930_v27 = vsel %vm383_vm0, %v2959_v17, -inf  ;;  %v2969_v29 = vadd.f32 %v2158_v19, %v900_v12 }
 0x295   : > { %v561_v23 = vpop.f32.mrf.mxu1  ;;  %v623_v24 = vpop.f32.mrf.mxu0 }
 0x296   : > { %v2965_v26 = vadd.f32 %v899_v22, %v561_v23  ;;  %v939_v32 = vsel %vm383_vm0, %v2963_v25, -inf  ;;  %v2977_v34 = vadd.f32 %v898_v14, %v623_v24  ;;  %v948_v35 = vsel %vm383_vm0, %v2969_v29, -inf }
 0x297   : > { %v2159_v28 = vpop.f32.mrf.mxu0  ;;  %931 = vmax.xlane.f32.xlu0 %v930_v27 }
 0x298   : > { %v933_v30 = vsel %vm383_vm0, %v2965_v26, -inf  ;;  %v2973_v31 = vadd.f32 %v2159_v28, %v901_v21  ;;  %v942_v40 = vsel %vm383_vm0, %v2977_v34, -inf }
 0x299   : > { %934 = vmax.xlane.f32.xlu1 %v933_v30  ;;  %v626_v33 = vpop.f32.mrf.mxu0 }
 0x29a   : > { %v2981_v36 = vadd.f32 %v899_v22, %v626_v33  ;;  %v951_v37 = vsel %vm383_vm0, %v2973_v31, -inf }
 0x29b   : > { %940 = vmax.xlane.f32.xlu0 %v939_v32 }
 0x29c   : > { %v945_v46 = vsel %vm383_vm0, %v2981_v36, -inf }
 0x29d   : > { %949 = vmax.xlane.f32.xlu1 %v948_v35 }
 0x29f   : > { %952 = vmax.xlane.f32.xlu0 %v951_v37  ;;  %v2166_v38 = vpop.f32.mrf.mxu1 }
 0x2a0   : > { %v2985_v39 = vadd.f32 %v2166_v38, %v900_v12 }
 0x2a1   : > { %943 = vmax.xlane.f32.xlu1 %v942_v40  ;;  %v688_v45 = vpop.f32.mrf.mxu1 }
 0x2a2   : > { %v2991_v48 = vadd.f32 %v898_v14, %v688_v45  ;;  %v960_v50 = vsel %vm383_vm0, %v2985_v39, -inf }
 0x2a3   : > { %946 = vmax.xlane.f32.xlu0 %v945_v46  ;;  %v2167_v47 = vpop.f32.mrf.mxu1 }
 0x2a4   : > { %v2993_v49 = vadd.f32 %v2167_v47, %v901_v21  ;;  %v954_v54 = vsel %vm383_vm0, %v2991_v48, -inf }
 0x2a5   : > { %961 = vmax.xlane.f32.xlu1 %v960_v50  ;;  %v691_v51 = vpop.f32.mrf.mxu1 }
 0x2a6   : > { %v2997_v52 = vadd.f32 %v899_v22, %v691_v51  ;;  %v963_v53 = vsel %vm383_vm0, %v2993_v49, -inf  ;;  %v3055_v51 = vpop.permute.xlu1 %1389 }
 0x2a7   : > { %964 = vmax.xlane.f32.xlu0 %v963_v53 }
 0x2a8   : > { %v957_v55 = vsel %vm383_vm0, %v2997_v52, -inf }
 0x2a9   : > { %955 = vmax.xlane.f32.xlu1 %v954_v54 }
 0x2ab   : > { %958 = vmax.xlane.f32.xlu0 %v957_v55 }
 0x2ee   : > { %v2174_v57 = vpop.f32.mrf.mxu0 }
 0x2ef   : > { %v3005_v59 = vadd.f32 %v2174_v57, %v904_v56 }
 0x2f0   : > { %v753_v60 = vpop.f32.mrf.mxu0 }
 0x2f1   : > { %v3007_v62 = vadd.f32 %v902_v58, %v753_v60  ;;  %v972_v63 = vsel %vm383_vm0, %v3005_v59, -inf }
 0x2f2   : > { %v2175_v0 = vpop.f32.mrf.mxu0  ;;  %973 = vmax.xlane.f32.xlu1 %v972_v63 }
 0x2f3   : > { %v3011_v2 = vadd.f32 %v2175_v0, %v905_v61  ;;  %v966_v6 = vsel %vm383_vm0, %v3007_v62, -inf }
 0x2f4   : > { %v756_v3 = vpop.f32.mrf.mxu0 }
 0x2f5   : > { %v3013_v5 = vadd.f32 %v903_v1, %v756_v3  ;;  %v975_v7 = vsel %vm383_vm0, %v3011_v2, -inf }
 0x2f6   : > { %967 = vmax.xlane.f32.xlu1 %v966_v6  ;;  %976 = vmax.xlane.f32.xlu0 %v975_v7  ;;  %v2182_v8 = vpop.f32.mrf.mxu1 }
 0x2f7   : > { %v3019_v11 = vadd.f32 %v2182_v8, %v904_v56  ;;  %v969_v14 = vsel %vm383_vm0, %v3013_v5, -inf }
 0x2f8   : > { %v818_v12 = vpop.f32.mrf.mxu1 }
 0x2f9   : > { %v3021_v13 = vadd.f32 %v902_v58, %v818_v12  ;;  %v984_v16 = vsel %vm383_vm0, %v3019_v11, -inf }
 0x2fa   : > { %970 = vmax.xlane.f32.xlu0 %v969_v14  ;;  %985 = vmax.xlane.f32.xlu1 %v984_v16  ;;  %v2183_v18 = vpop.f32.mrf.mxu1 }
 0x2fb   : > { %v3027_v19 = vadd.f32 %v2183_v18, %v905_v61  ;;  %v978_v22 = vsel %vm383_vm0, %v3021_v13, -inf }
 0x2fc   : > { %v821_v20 = vpop.f32.mrf.mxu1 }
 0x2fd   : > { %v3029_v21 = vadd.f32 %v903_v1, %v821_v20  ;;  %v987_v23 = vsel %vm383_vm0, %v3027_v19, -inf }
 0x2fe   : > { %v2190_v24 = vpop.f32.mrf.mxu0  ;;  %979 = vmax.xlane.f32.xlu1 %v978_v22  ;;  %988 = vmax.xlane.f32.xlu0 %v987_v23 }
 0x2ff   : > { %v3035_v27 = vadd.f32 %v2190_v24, %v904_v56  ;;  %v981_v33 = vsel %vm383_vm0, %v3029_v21, -inf }
 0x300   : > { %v883_v28 = vpop.f32.mrf.mxu0 }
 0x301   : > { %v3037_v30 = vadd.f32 %v902_v58, %v883_v28  ;;  %v996_v32 = vsel %vm383_vm0, %v3035_v27, -inf }
 0x302   : > { %v2191_v35 = vpop.f32.mrf.mxu0  ;;  %997 = vmax.xlane.f32.xlu1 %v996_v32  ;;  %982 = vmax.xlane.f32.xlu0 %v981_v33 }
 0x303   : > { %v3043_v37 = vadd.f32 %v2191_v35, %v905_v61  ;;  %v990_v45 = vsel %vm383_vm0, %v3037_v30, -inf }
 0x304   : > { %v886_v38 = vpop.f32.mrf.mxu0 }
 0x305   : > { %v3045_v40 = vadd.f32 %v903_v1, %v886_v38  ;;  %v999_v46 = vsel %vm383_vm0, %v3043_v37, -inf }
 0x306   : > { %991 = vmax.xlane.f32.xlu1 %v990_v45  ;;  %1000 = vmax.xlane.f32.xlu0 %v999_v46 }
 0x307   : > { %v993_v47 = vsel %vm383_vm0, %v3045_v40, -inf }
 0x30a   : > { %994 = vmax.xlane.f32.xlu0 %v993_v47 }
 0x317   : > { %1450 = vrot.lane.b32.xlu1 %v2889_v42, %s2665_s10 }
 0x31c   : > { %v938_v50 = vpop.xlane.xlu0 %937 }
 0x31d   : > { %v1004_v54 = vsub.f32 %v2957_v15, %v938_v50 }
 0x31f   : > { %v1030_v58 = vmul.f32 1.442695, %v1004_v54 }
 0x320   : > { %v932_v53 = vpop.xlane.xlu0 %931  ;;  %1452 = vrot.lane.b32.xlu0 %v2886_v41, %s2665_s10 }
 0x321   : > { %v1002_v57 = vsub.f32 %v2959_v17, %v932_v53  ;;  %2379 = vpow2.f32 %v1030_v58 }
 0x322   : > { %v935_v55 = vpop.xlane.xlu1 %934 }
 0x323   : > { %v1026_v0 = vmul.f32 1.442695, %v1002_v57  ;;  %v1003_v42 = vsub.f32 %v2965_v26, %v935_v55 }
 0x324   : > { %v941_v56 = vpop.xlane.xlu0 %940 }
 0x325   : > { %v1005_v60 = vsub.f32 %v2963_v25, %v941_v56  ;;  %2381 = vpow2.f32 %v1026_v0  ;;  %v1028_v15 = vmul.f32 1.442695, %v1003_v42 }
 0x326   : > { %v950_v61 = vpop.xlane.xlu1 %949 }
 0x327   : > { %v1032_v1 = vmul.f32 1.442695, %v1005_v60  ;;  %v1008_v3 = vsub.f32 %v2969_v29, %v950_v61 }
 0x328   : > { %v953_v63 = vpop.xlane.xlu0 %952 }
 0x329   : > { %v1009_v7 = vsub.f32 %v2973_v31, %v953_v63  ;;  %2383 = vpow2.f32 %v1032_v1  ;;  %v1038_v17 = vmul.f32 1.442695, %v1008_v3 }
 0x32a   : > { %v944_v6 = vpop.xlane.xlu1 %943  ;;  %2385 = vpow2.f32 %v1028_v15 }
 0x32b   : > { %v1006_v8 = vsub.f32 %v2977_v34, %v944_v6  ;;  %v1040_v12 = vmul.f32 1.442695, %v1009_v7  ;;  %2387 = vpow2.f32 %v1038_v17 }
 0x32c   : > { %v947_v41 = vpop.xlane.xlu0 %946 }
 0x32d   : > { %v1007_v14 = vsub.f32 %v2981_v36, %v947_v41  ;;  %v1034_v16 = vmul.f32 1.442695, %v1006_v8  ;;  %2389 = vpow2.f32 %v1040_v12 }
 0x32e   : > { %v962_v25 = vpop.xlane.xlu1 %961  ;;  %v3070_v34 = vpop.eup %2379 }
 0x32f   : > { %v1012_v29 = vsub.f32 %v2985_v39, %v962_v25  ;;  %v1036_v20 = vmul.f32 1.442695, %v1007_v14  ;;  %2391 = vpow2.f32 %v1034_v16  ;;  %v1080_v33 = vsel %vm383_vm0, %v3070_v34, 0.0 }
 0x330   : > { %v965_v26 = vpop.xlane.xlu0 %964 }
 0x331   : > { %v1013_v22 = vsub.f32 %v2993_v49, %v965_v26  ;;  %v1046_v31 = vmul.f32 1.442695, %v1012_v29  ;;  %2393 = vpow2.f32 %v1036_v20 }
 0x332   : > { %v956_v18 = vpop.xlane.xlu1 %955  ;;  %v3072_v36 = vpop.eup %2381 }
 0x333   : > { %v1010_v23 = vsub.f32 %v2991_v48, %v956_v18  ;;  %v1048_v28 = vmul.f32 1.442695, %v1013_v22  ;;  %2395 = vpow2.f32 %v1046_v31  ;;  %v1074_v38 = vsel %vm383_vm0, %v3072_v36, 0.0 }
 0x334   : > { %v959_v24 = vpop.xlane.xlu0 %958 }
 0x335   : > { %v1042_v32 = vmul.f32 1.442695, %v1010_v23  ;;  %v1011_v39 = vsub.f32 %v2997_v52, %v959_v24  ;;  %2397 = vpow2.f32 %v1048_v28 }
 0x336   : > { %v3077_v35 = vpop.eup %2383 }
 0x337   : > { %v3079_v49 = vpop.eup %2385  ;;  %2399 = vpow2.f32 %v1042_v32  ;;  %v1044_v48 = vmul.f32 1.442695, %v1011_v39  ;;  %v1083_v45 = vsel %vm383_vm0, %v3077_v35, 0.0 }
 0x338   : > { %v3085_v46 = vpop.eup %2387  ;;  %v1077_v50 = vsel %vm383_vm0, %v3079_v49, 0.0 }
 0x339   : > { %2401 = vpow2.f32 %v1044_v48  ;;  %v1092_v47 = vsel %vm383_vm0, %v3085_v46, 0.0 }
 0x33a   : > { %v3087_v52 = vpop.eup %2389 }
 0x33b   : > { %1081 = vadd.xlane.f32.xlu1 %v1080_v33  ;;  %v1095_v56 = vsel %vm383_vm0, %v3087_v52, 0.0 }
 0x33c   : > { %v3093_v53 = vpop.eup %2391 }
 0x33d   : > { %v1086_v55 = vsel %vm383_vm0, %v3093_v53, 0.0 }
 0x33e   : > { %v3095_v54 = vpop.eup %2393 }
 0x33f   : > { %1075 = vadd.xlane.f32.xlu1 %v1074_v38  ;;  %1084 = vadd.xlane.f32.xlu0 %v1083_v45  ;;  %v1089_v61 = vsel %vm383_vm0, %v3095_v54, 0.0 }
 0x340   : > { %v3101_v57 = vpop.eup %2395 }
 0x341   : > { %v1104_v60 = vsel %vm383_vm0, %v3101_v57, 0.0 }
 0x342   : > { %v3103_v58 = vpop.eup %2397 }
 0x343   : > { %1093 = vadd.xlane.f32.xlu1 %v1092_v47  ;;  %1078 = vadd.xlane.f32.xlu0 %v1077_v50  ;;  %v1107_v42 = vsel %vm383_vm0, %v3103_v58, 0.0 }
 0x344   : > { %v3109_v63 = vpop.eup %2399 }
 0x345   : > { %v1098_v0 = vsel %vm383_vm0, %v3109_v63, 0.0 }
 0x346   : > { %v3115_v1 = vpop.eup %2401 }
 0x347   : > { %1087 = vadd.xlane.f32.xlu1 %v1086_v55  ;;  %1096 = vadd.xlane.f32.xlu0 %v1095_v56  ;;  %v1101_v3 = vsel %vm383_vm0, %v3115_v1, 0.0 }
 0x34b   : > { %1105 = vadd.xlane.f32.xlu1 %v1104_v60  ;;  %1090 = vadd.xlane.f32.xlu0 %v1089_v61 }
 0x34f   : > { %1099 = vadd.xlane.f32.xlu1 %v1098_v0  ;;  %1108 = vadd.xlane.f32.xlu0 %v1107_v42 }
 0x353   : > { %1102 = vadd.xlane.f32.xlu0 %v1101_v3 }
 0x37b   : > { %v974_v6 = vpop.xlane.xlu1 %973 }
 0x37c   : > { %v1016_v41 = vsub.f32 %v3005_v59, %v974_v6 }
 0x37e   : > { %v1054_v15 = vmul.f32 1.442695, %v1016_v41 }
 0x37f   : > { %v968_v7 = vpop.xlane.xlu1 %967  ;;  %v977_v17 = vpop.xlane.xlu0 %976 }
 0x380   : > { %2403 = vpow2.f32 %v1054_v15  ;;  %v1014_v8 = vsub.f32 %v3007_v62, %v968_v7  ;;  %v1017_v25 = vsub.f32 %v3011_v2, %v977_v17 }
 0x382   : > { %v1050_v12 = vmul.f32 1.442695, %v1014_v8  ;;  %v1056_v14 = vmul.f32 1.442695, %v1017_v25 }
 0x383   : > { %v971_v26 = vpop.xlane.xlu0 %970  ;;  %v986_v16 = vpop.xlane.xlu1 %985 }
 0x384   : > { %2405 = vpow2.f32 %v1050_v12  ;;  %v1015_v29 = vsub.f32 %v3013_v5, %v971_v26  ;;  %v1020_v18 = vsub.f32 %v3019_v11, %v986_v16 }
 0x385   : > { %2407 = vpow2.f32 %v1056_v14 }
 0x386   : > { %v1052_v20 = vmul.f32 1.442695, %v1015_v29  ;;  %v1062_v59 = vmul.f32 1.442695, %v1020_v18 }
 0x387   : > { %v980_v22 = vpop.xlane.xlu1 %979  ;;  %v989_v31 = vpop.xlane.xlu0 %988 }
 0x388   : > { %2409 = vpow2.f32 %v1052_v20  ;;  %v1018_v23 = vsub.f32 %v3021_v13, %v980_v22  ;;  %v1021_v2 = vsub.f32 %v3027_v19, %v989_v31 }
 0x389   : > { %2411 = vpow2.f32 %v1062_v59 }
 0x38a   : > { %v1058_v62 = vmul.f32 1.442695, %v1018_v23  ;;  %v1064_v33 = vmul.f32 1.442695, %v1021_v2 }
 0x38b   : > { %v998_v24 = vpop.xlane.xlu1 %997  ;;  %v983_v28 = vpop.xlane.xlu0 %982 }
 0x38c   : > { %v1024_v32 = vsub.f32 %v3035_v27, %v998_v24  ;;  %2413 = vpow2.f32 %v1058_v62  ;;  %v1019_v48 = vsub.f32 %v3029_v21, %v983_v28 }
 0x38d   : > { %v3127_v39 = vpop.eup %2403 }
 0x38e   : > { %v1070_v5 = vmul.f32 1.442695, %v1024_v32  ;;  %v1116_v11 = vsel %vm383_vm0, %v3127_v39, 0.0  ;;  %v1060_v60 = vmul.f32 1.442695, %v1019_v48 }
 0x38f   : > { %1117 = vadd.xlane.f32.xlu1 %v1116_v11  ;;  %v992_v13 = vpop.xlane.xlu1 %991  ;;  %v1001_v38 = vpop.xlane.xlu0 %1000 }
 0x390   : > { %2415 = vpow2.f32 %v1070_v5  ;;  %v1022_v19 = vsub.f32 %v3037_v30, %v992_v13  ;;  %v1025_v45 = vsub.f32 %v3043_v37, %v1001_v38 }
 0x391   : > { %v3134_v47 = vpop.eup %2405  ;;  %2417 = vpow2.f32 %v1064_v33 }
 0x392   : > { %v3136_v27 = vpop.eup %2407  ;;  %v1066_v50 = vmul.f32 1.442695, %v1022_v19  ;;  %v1072_v55 = vmul.f32 1.442695, %v1025_v45  ;;  %v1110_v56 = vsel %vm383_vm0, %v3134_v47, 0.0 }
 0x393   : > { %1111 = vadd.xlane.f32.xlu1 %v1110_v56  ;;  %v1119_v21 = vsel %vm383_vm0, %v3136_v27, 0.0  ;;  %v995_v61 = vpop.xlane.xlu0 %994  ;;  %v3184_v22 = vpop.permute.xlu1 %1450 }
 0x394   : > { %2419 = vpow2.f32 %v1066_v50  ;;  %1120 = vadd.xlane.f32.xlu0 %v1119_v21  ;;  %v1023_v30 = vsub.f32 %v3045_v40, %v995_v61 }
 0x395   : > { %v3143_v37 = vpop.eup %2409  ;;  %2421 = vpow2.f32 %v1072_v55 }
 0x396   : > { %v1113_v0 = vsel %vm383_vm0, %v3143_v37, 0.0  ;;  %2423 = vpow2.f32 %v1060_v60  ;;  %v1068_v42 = vmul.f32 1.442695, %v1023_v30  ;;  %v3149_v6 = vpop.eup %2411 }
 0x397   : > { %v3147_v3 = vpop.permute.xlu0 %1452  ;;  %v1128_v41 = vsel %vm383_vm0, %v3149_v6, 0.0 }
 0x398   : > { %1114 = vadd.xlane.f32.xlu0 %v1113_v0  ;;  %2224 = vmatprep.subr.bf16.mxu0 %v3147_v3  ;;  %2425 = vpow2.f32 %v1068_v42 }
 0x399   : > { %v3154_v40 = vpop.eup %2413 }
 0x39a   : > { %v1122_v17 = vsel %vm383_vm0, %v3154_v40, 0.0 }
 0x39c   : > { %1129 = vadd.xlane.f32.xlu0 %v1128_v41 }
 0x39d   : > { %v3156_v15 = vpop.eup %2415 }
 0x39e   : > { %v1140_v7 = vsel %vm383_vm0, %v3156_v15, 0.0  ;;  %v3162_v8 = vpop.eup %2417 }
 0x39f   : > { %1141 = vadd.xlane.f32.xlu1 %v1140_v7  ;;  %v1131_v26 = vsel %vm383_vm0, %v3162_v8, 0.0 }
 0x3a0   : > { %1123 = vadd.xlane.f32.xlu0 %v1122_v17 }
 0x3a1   : > { %v3164_v25 = vpop.eup %2419 }
 0x3a2   : > { %v1134_v12 = vsel %vm383_vm0, %v3164_v25, 0.0  ;;  %v3168_v14 = vpop.eup %2421 }
 0x3a3   : > { %1135 = vadd.xlane.f32.xlu1 %v1134_v12  ;;  %v3172_v16 = vpop.eup %2423  ;;  %v1143_v29 = vsel %vm383_vm0, %v3168_v14, 0.0 }
 0x3a4   : > { %1132 = vadd.xlane.f32.xlu0 %v1131_v26  ;;  %v1125_v18 = vsel %vm383_vm0, %v3172_v16, 0.0 }
 0x3a5   : > { %v3178_v20 = vpop.eup %2425 }
 0x3a6   : > { %v1137_v59 = vsel %vm383_vm0, %v3178_v20, 0.0 }
 0x3a7   : > { %1144 = vadd.xlane.f32.xlu1 %v1143_v29 }
 0x3a8   : > { %1126 = vadd.xlane.f32.xlu0 %v1125_v18 }
 0x3ac   : > { %1138 = vadd.xlane.f32.xlu0 %v1137_v59 }
 0x3b8   : > { %1511 = vrot.lane.b32.xlu1 %v2895_v44, %s2665_s10 }
 0x3c2   : > { %1513 = vrot.lane.b32.xlu0 %v2892_v43, %s2665_s10 }
 0x3c4   : > { %v1082_v31 = vpop.xlane.xlu1 %1081 }
 0x3c8   : > { %v1076_v23 = vpop.xlane.xlu1 %1075  ;;  %v1085_v62 = vpop.xlane.xlu0 %1084 }
 0x3c9   : > { %2427 = vrcp.f32 %v1085_v62 }
 0x3ca   : > { %2429 = vrcp.f32 %v1076_v23 }
 0x3cb   : > { %2431 = vrcp.f32 %v1082_v31 }
 0x3cc   : > { %v1094_v2 = vpop.xlane.xlu1 %1093  ;;  %v1079_v24 = vpop.xlane.xlu0 %1078 }
 0x3cd   : > { %2433 = vrcp.f32 %v1079_v24 }
 0x3d0   : > { %v1088_v28 = vpop.xlane.xlu1 %1087  ;;  %v1097_v32 = vpop.xlane.xlu0 %1096 }
 0x3d1   : > { %2435 = vrcp.f32 %v1097_v32 }
 0x3d2   : > { %2437 = vrcp.f32 %v1088_v28 }
 0x3d3   : > { %2439 = vrcp.f32 %v1094_v2 }
 0x3d4   : > { %v1106_v5 = vpop.xlane.xlu1 %1105  ;;  %v1091_v44 = vpop.xlane.xlu0 %1090 }
 0x3d5   : > { %2441 = vrcp.f32 %v1091_v44 }
 0x3d6   : > { %v2428_v11 = vpop.eup %2427 }
 0x3d7   : > { %v2430_v48 = vpop.eup %2429  ;;  %v1173_v19 = vmul.f32 %v2428_v11, %v3077_v35 }
 0x3d8   : > { %v1100_v33 = vpop.xlane.xlu1 %1099  ;;  %v1109_v43 = vpop.xlane.xlu0 %1108  ;;  %v1170_v50 = vmul.f32 %v2430_v48, %v3072_v36 }
 0x3d9   : > { %v2432_v13 = vpop.eup %2431  ;;  %2443 = vrcp.f32 %v1109_v43 }
 0x3da   : > { %v2434_v38 = vpop.eup %2433  ;;  %2445 = vrcp.f32 %v1100_v33  ;;  %v1172_v56 = vmul.f32 %v2432_v13, %v3070_v34 }
 0x3db   : > { %2447 = vrcp.f32 %v1106_v5  ;;  %v1171_v55 = vmul.f32 %v2434_v38, %v3079_v49 }
 0x3dc   : > { %v1103_v45 = vpop.xlane.xlu0 %1102  ;;  %v1195_v21 = vpack.c.bf16 %v1173_v19, %v1172_v56 }
 0x3dd   : > { %2449 = vrcp.f32 %v1103_v45  ;;  %v1194_v60 = vpack.c.bf16 %v1171_v55, %v1170_v50 }
 0x3de   : > { %v2436_v61 = vpop.eup %2435 }
 0x3df   : > { %2196 = vmatprep.mubr.msk.bf16.mxu1 %vm383_vm0, %v1194_v60  ;;  %v2438_v30 = vpop.eup %2437  ;;  %v1177_v36 = vmul.f32 %v2436_v61, %v3087_v52 }
 0x3e0   : > { %2197 = vmatmul.mubr.msk.bf16.vlgmr.msra.gmra.mxu1 %vm383_vm0, %v1195_v21  ;;  %v2440_v0 = vpop.eup %2439  ;;  %v1174_v49 = vmul.f32 %v2438_v30, %v3093_v53 }
 0x3e1   : > { %2201 = vmatpush3.bf16.msra.mxu1 %v2945_v4  ;;  %v1176_v42 = vmul.f32 %v2440_v0, %v3085_v46 }
 0x3e2   : > { %v2442_v35 = vpop.eup %2441  ;;  %2202 = vmatprep.subr.bf16.mxu1 %v2950_v9 }
 0x3e3   : > { %v1175_v34 = vmul.f32 %v2442_v35, %v3095_v54  ;;  %v1197_v17 = vpack.c.bf16 %v1177_v36, %v1176_v42 }
 0x3e5   : > { %2203 = vmatpush3.bf16.msra.mxu1 %v2950_v9  ;;  %v1196_v41 = vpack.c.bf16 %v1175_v34, %v1174_v49 }
 0x3e6   : > { %v2444_v7 = vpop.eup %2443  ;;  %2216 = vmatprep.subr.bf16.mxu1 %v2955_v10 }
 0x3e7   : > { %v2446_v12 = vpop.eup %2445  ;;  %2204 = vmatprep.mubr.msk.bf16.mxu1 %vm383_vm0, %v1196_v41  ;;  %v1181_v53 = vmul.f32 %v2444_v7, %v3103_v58 }
 0x3e8   : > { %v2448_v4 = vpop.eup %2447  ;;  %2205 = vmatmul.mubr.msk.bf16.vlgmr.msra.gmra.mxu1 %vm383_vm0, %v1197_v17  ;;  %v1178_v9 = vmul.f32 %v2446_v12, %v3109_v63 }
 0x3e9   : > { %2217 = vmatpush3.bf16.msra.mxu1 %v2955_v10  ;;  %v1180_v54 = vmul.f32 %v2448_v4, %v3101_v57 }
 0x3ea   : > { %v2450_v52 = vpop.eup %2449  ;;  %2218 = vmatprep.subr.bf16.mxu1 %v3055_v51 }
 0x3eb   : > { %v1179_v46 = vmul.f32 %v2450_v52, %v3115_v1  ;;  %v1199_v29 = vpack.c.bf16 %v1181_v53, %v1180_v54  ;;  %v2377_v1 = vld [vmem:[#allocation7] sm:$0xff]  }
 0x3ed   : > { %v1198_v26 = vpack.c.bf16 %v1179_v46, %v1178_v9  ;;  %2219 = vmatpush3.bf16.msra.mxu1 %v3055_v51 }
 0x3ef   : > { %2212 = vmatprep.mubr.msk.bf16.mxu0 %vm383_vm0, %v1198_v26 }
 0x3f0   : > { %2213 = vmatmul.mubr.msk.bf16.vlgmr.msra.gmra.mxu0 %vm383_vm0, %v1199_v29 }
 0x3f1   : > { %2225 = vmatpush3.bf16.msra.mxu0 %v3147_v3 }
 0x3f2   : > { %2226 = vmatprep.subr.bf16.mxu0 %v3184_v22 }
 0x3f5   : > { %2227 = vmatpush3.bf16.msra.mxu0 %v3184_v22 }
 0x3f6   : > { %2240 = vmatprep.subr.bf16.mxu0 %v2377_v1 }
 0x418   : > { %v1118_v10 = vpop.xlane.xlu1 %1117 }
 0x41c   : > { %v1112_v58 = vpop.xlane.xlu1 %1111 }
 0x41d   : > { %v1121_v63 = vpop.xlane.xlu0 %1120 }
 0x41e   : > { %2451 = vrcp.f32 %v1121_v63 }
 0x41f   : > { %2453 = vrcp.f32 %v1112_v58 }
 0x420   : > { %2455 = vrcp.f32 %v1118_v10 }
 0x421   : > { %v1115_v57 = vpop.xlane.xlu0 %1114 }
 0x422   : > { %2457 = vrcp.f32 %v1115_v57 }
 0x425   : > { %v1130_v51 = vpop.xlane.xlu0 %1129 }
 0x428   : > { %v1142_v18 = vpop.xlane.xlu1 %1141 }
 0x429   : > { %v1124_v59 = vpop.xlane.xlu0 %1123 }
 0x42b   : > { %v2452_v31 = vpop.eup %2451 }
 0x42c   : > { %v1136_v23 = vpop.xlane.xlu1 %1135  ;;  %v2454_v3 = vpop.eup %2453  ;;  %v1185_v22 = vmul.f32 %v2452_v31, %v3136_v27 }
 0x42d   : > { %v1133_v62 = vpop.xlane.xlu0 %1132  ;;  %v2456_v2 = vpop.eup %2455  ;;  %v1182_v32 = vmul.f32 %v2454_v3, %v3134_v47 }
 0x42e   : > { %2459 = vrcp.f32 %v1133_v62  ;;  %v1184_v11 = vmul.f32 %v2456_v2, %v3127_v39 }
 0x42f   : > { %v2458_v24 = vpop.eup %2457  ;;  %2461 = vrcp.f32 %v1124_v59 }
 0x430   : > { %v1145_v28 = vpop.xlane.xlu1 %1144  ;;  %v1183_v5 = vmul.f32 %v2458_v24, %v3143_v37  ;;  %2463 = vrcp.f32 %v1130_v51  ;;  %v1201_v43 = vpack.c.bf16 %v1185_v22, %v1184_v11 }
 0x431   : > { %v1127_v44 = vpop.xlane.xlu0 %1126 }
 0x432   : > { %2465 = vrcp.f32 %v1127_v44  ;;  %v1200_v33 = vpack.c.bf16 %v1183_v5, %v1182_v32 }
 0x433   : > { %2467 = vrcp.f32 %v1145_v28 }
 0x434   : > { %2469 = vrcp.f32 %v1136_v23  ;;  %2220 = vmatprep.mubr.msk.bf16.mxu1 %vm383_vm0, %v1200_v33  ;;  %v1512_v47 = vpop.permute.xlu1 %1511 }
 0x435   : > { %2471 = vrcp.f32 %v1142_v18  ;;  %2221 = vmatmul.mubr.msk.bf16.vlgmr.msra.gmra.mxu1 %vm383_vm0, %v1201_v43  ;;  %v1139_v27 = vpop.xlane.xlu0 %1138 }
 0x436   : > { %2473 = vrcp.f32 %v1139_v27 }
 0x439   : > { %v1514_v48 = vpop.permute.xlu0 %1513 }
 0x43a   : > { %2232 = vmatprep.subr.bf16.mxu1 %v1514_v48 }
 0x43b   : > { %2233 = vmatpush3.bf16.msra.mxu1 %v1514_v48  ;;  %v2460_v37 = vpop.eup %2459 }
 0x43c   : > { %2234 = vmatprep.subr.bf16.mxu1 %v1512_v47  ;;  %v2462_v13 = vpop.eup %2461  ;;  %v1189_v19 = vmul.f32 %v2460_v37, %v3162_v8 }
 0x43d   : > { %v2464_v39 = vpop.eup %2463  ;;  %v1186_v50 = vmul.f32 %v2462_v13, %v3154_v40  ;;  %v3252_v13 = vld [vmem:[%s3368_s4] ss:$0 sm:$0xff] }
 0x43e   : > { %v1188_v60 = vmul.f32 %v2464_v39, %v3149_v6  ;;  %v2378_v6 = vld [vmem:[#allocation7 + $0x8] sm:$0xff]  }
 0x43f   : > { %v2466_v38 = vpop.eup %2465  ;;  %2235 = vmatpush3.bf16.msra.mxu1 %v1512_v47 }
 0x440   : > { %v2468_v45 = vpop.eup %2467  ;;  %v1187_v55 = vmul.f32 %v2466_v38, %v3172_v16  ;;  %v1203_v0 = vpack.c.bf16 %v1189_v19, %v1188_v60  ;;  %2254 = vmatprep.subr.bf16.mxu1 %v2378_v6 }
 0x441   : > { %v2470_v56 = vpop.eup %2469  ;;  %v1193_v35 = vmul.f32 %v2468_v45, %v3168_v14 }
 0x442   : > { %v2472_v21 = vpop.eup %2471  ;;  %v1202_v61 = vpack.c.bf16 %v1187_v55, %v1186_v50  ;;  %v1190_v36 = vmul.f32 %v2470_v56, %v3164_v25 }
 0x443   : > { %v2474_v30 = vpop.eup %2473  ;;  %v1192_v40 = vmul.f32 %v2472_v21, %v3156_v15 }
 0x444   : > { %2228 = vmatprep.mubr.msk.bf16.mxu0 %vm383_vm0, %v1202_v61  ;;  %v1191_v8 = vmul.f32 %v2474_v30, %v3178_v20 }
 0x445   : > { %2229 = vmatmul.mubr.msk.bf16.vlgmr.msra.gmra.mxu0 %vm383_vm0, %v1203_v0  ;;  %v1205_v49 = vpack.c.bf16 %v1193_v35, %v1192_v40 }
 0x446   : > { %v1204_v16 = vpack.c.bf16 %v1191_v8, %v1190_v36  ;;  %2241 = vmatpush3.bf16.msra.mxu0 %v2377_v1 }
 0x448   : > { %2236 = vmatprep.mubr.msk.bf16.mxu1 %vm383_vm0, %v1204_v16 }
 0x449   : > { %2237 = vmatmul.mubr.msk.bf16.vlgmr.msra.gmra.mxu1 %vm383_vm0, %v1205_v49 }
 0x44a   : > { %2255 = vmatpush3.bf16.msra.mxu1 %v2378_v6 }
 0x4a0   : > { %v2198_v14 = vpop.f32.mrf.mxu1 }
 0x4a2   : > { %v1252_v34 = vpop.f32.mrf.mxu1 }
 0x4a4   : > { %v2199_v42 = vpop.f32.mrf.mxu1 }
 0x4a5   : > { %v1573_v20 = vpack.c.bf16 %v2199_v42, %v2198_v14 }
 0x4a6   : > { %v1255_v25 = vpop.f32.mrf.mxu1 }
 0x4a7   : > { %v1572_v41 = vpack.c.bf16 %v1255_v25, %v1252_v34 }
 0x4a8   : > { %v2206_v7 = vpop.f32.mrf.mxu1 }
 0x4a9   : > { %2242 = vmatprep.mubr.msk.bf16.mxu0 %vm511_vm1, %v1572_v41 }
 0x4aa   : > { %v1313_v15 = vpop.f32.mrf.mxu1  ;;  %2243 = vmatmul.mubr.msk.bf16.vlgmr.msra.gmra.mxu0 %vm511_vm1, %v1573_v20 }
 0x4ac   : > { %v2207_v17 = vpop.f32.mrf.mxu1 }
 0x4ad   : > { %v1575_v53 = vpack.c.bf16 %v2207_v17, %v2206_v7 }
 0x4ae   : > { %v1316_v12 = vpop.f32.mrf.mxu1 }
 0x4af   : > { %v1574_v4 = vpack.c.bf16 %v1316_v12, %v1313_v15 }
 0x4b0   : > { %v2214_v52 = vpop.f32.mrf.mxu0 }
 0x4b1   : > { %2246 = vmatprep.mubr.msk.bf16.mxu0 %vm511_vm1, %v1574_v4 }
 0x4b2   : > { %v1374_v9 = vpop.f32.mrf.mxu0  ;;  %2247 = vmatmul.mubr.msk.bf16.gmra.mxu0 %vm511_vm1, %v1575_v53 }
 0x4b4   : > { %v2215_v46 = vpop.f32.mrf.mxu0 }
 0x4b5   : > { %v1577_v29 = vpack.c.bf16 %v2215_v46, %v2214_v52 }
 0x4b6   : > { %v1377_v54 = vpop.f32.mrf.mxu0 }
 0x4b7   : > { %v1576_v26 = vpack.c.bf16 %v1377_v54, %v1374_v9 }
 0x4b9   : > { %2250 = vmatprep.mubr.msk.bf16.mxu0 %vm511_vm1, %v1576_v26 }
 0x4ba   : > { %2251 = vmatmul.mubr.msk.bf16.gmra.mxu0 %vm511_vm1, %v1577_v29 }
 0x4f5   : > { %v2222_v10 = vpop.f32.mrf.mxu1 }
 0x4f7   : > { %v1435_v58 = vpop.f32.mrf.mxu1 }
 0x4f9   : > { %v2223_v63 = vpop.f32.mrf.mxu1 }
 0x4fa   : > { %v1579_v1 = vpack.c.bf16 %v2223_v63, %v2222_v10 }
 0x4fb   : > { %v1438_v57 = vpop.f32.mrf.mxu1 }
 0x4fc   : > { %v1578_v51 = vpack.c.bf16 %v1438_v57, %v1435_v58 }
 0x4fe   : > { %2256 = vmatprep.mubr.msk.bf16.mxu1 %vm511_vm1, %v1578_v51 }
 0x4ff   : > { %2257 = vmatmul.mubr.msk.bf16.vlgmr.msra.gmra.mxu1 %vm511_vm1, %v1579_v1 }
 0x505   : > { %v2230_v18 = vpop.f32.mrf.mxu0 }
 0x507   : > { %v1496_v59 = vpop.f32.mrf.mxu0 }
 0x509   : > { %v2231_v31 = vpop.f32.mrf.mxu0  ;;  %v2238_v23 = vpop.f32.mrf.mxu1 }
 0x50a   : > { %v1581_v24 = vpack.c.bf16 %v2231_v31, %v2230_v18 }
 0x50b   : > { %v1499_v3 = vpop.f32.mrf.mxu0  ;;  %v1557_v62 = vpop.f32.mrf.mxu1 }
 0x50c   : > { %v1580_v2 = vpack.c.bf16 %v1499_v3, %v1496_v59 }
 0x50d   : > { %v2239_v22 = vpop.f32.mrf.mxu1 }
 0x50e   : > { %2260 = vmatprep.mubr.msk.bf16.mxu1 %vm511_vm1, %v1580_v2  ;;  %v1583_v5 = vpack.c.bf16 %v2239_v22, %v2238_v23 }
 0x50f   : > { %v1560_v28 = vpop.f32.mrf.mxu1  ;;  %2261 = vmatmul.mubr.msk.bf16.gmra.mxu1 %vm511_vm1, %v1581_v24 }
 0x510   : > { %v1582_v32 = vpack.c.bf16 %v1560_v28, %v1557_v62 }
 0x512   : > { %2264 = vmatprep.mubr.msk.bf16.mxu1 %vm511_vm1, %v1582_v32 }
 0x517   : > { %2265 = vmatmul.mubr.msk.bf16.gmra.mxu1 %vm511_vm1, %v1583_v5 }
 0x56a   : > { %v2244_v44 = vpop.f32.mrf.mxu0 }
 0x56b   : > { %v1804_v47 = vsel %vm383_vm0, %v2244_v44, 0.0 }
 0x56c   : > { %v1646_v11 = vpop.f32.mrf.mxu0 }
 0x56d   : > { %v1798_v19 = vsel %vm383_vm0, %v1646_v11, 0.0 }
 0x56e   : > { %v2245_v33 = vpop.f32.mrf.mxu0 }
 0x56f   : > { %v1807_v21 = vsel %vm383_vm0, %v2245_v33, 0.0 }
 0x570   : > { %v1649_v43 = vpop.f32.mrf.mxu0 }
 0x571   : > { %v1801_v36 = vsel %vm383_vm0, %v1649_v43, 0.0 }
 0x572   : > { %v2248_v27 = vpop.f32.mrf.mxu0 }
 0x573   : > { %v1816_v25 = vsel %vm383_vm0, %v2248_v27, 0.0 }
 0x574   : > { %v1662_v50 = vpop.f32.mrf.mxu0 }
 0x575   : > { %v1810_v15 = vsel %vm383_vm0, %v1662_v50, 0.0 }
 0x576   : > { %v2249_v40 = vpop.f32.mrf.mxu0 }
 0x577   : > { %v1819_v9 = vsel %vm383_vm0, %v2249_v40, 0.0 }
 0x578   : > { %v1665_v14 = vpop.f32.mrf.mxu0 }
 0x579   : > { %v1813_v10 = vsel %vm383_vm0, %v1665_v14, 0.0 }
 0x57a   : > { %v2252_v34 = vpop.f32.mrf.mxu0 }
 0x57b   : > { %v1828_v18 = vsel %vm383_vm0, %v2252_v34, 0.0 }
 0x57c   : > { %v1678_v12 = vpop.f32.mrf.mxu0 }
 0x57d   : > { %v1822_v62 = vsel %vm383_vm0, %v1678_v12, 0.0 }
 0x57e   : > { %v2253_v63 = vpop.f32.mrf.mxu0 }
 0x57f   : > { %v1831_v5 = vsel %vm383_vm0, %v2253_v63, 0.0 }
 0x580   : > { %v1681_v24 = vpop.f32.mrf.mxu0 }
 0x581   : > { %v1825_v27 = vsel %vm383_vm0, %v1681_v24, 0.0 }
 0x5bf   : > { %v2258_v48 = vpop.f32.mrf.mxu1 }
 0x5c0   : > { %v1805_v37 = vsel %vm383_vm0, %v2258_v48, 0.0 }
 0x5c1   : > { %v1806_v39 = vadd.f32 %v1805_v37, %v1804_v47  ;;  %v1751_v38 = vpop.f32.mrf.mxu1 }
 0x5c2   : > { %v1799_v45 = vsel %vm383_vm0, %v1751_v38, 0.0 }
 0x5c3   : > { %v1843_v55 = vadd.f32 %v3252_v13, %v1806_v39  ;;  %v1800_v56 = vadd.f32 %v1799_v45, %v1798_v19  ;;  %v2259_v60 = vpop.f32.mrf.mxu1 }
 0x5c4   : > { %v1808_v61 = vsel %vm383_vm0, %v2259_v60, 0.0 }
 0x5c5   : > { %1855 = vst.msk [vmem:[%s3259_s14 + $0x10] sm:$0xff] %vm383_vm0, %v1843_v55  ;;  %v1841_v30 = vadd.f32 %v3252_v13, %v1800_v56  ;;  %v1809_v0 = vadd.f32 %v1808_v61, %v1807_v21  ;;  %v1754_v35 = vpop.f32.mrf.mxu1 }
 0x5c6   : > { %v1802_v8 = vsel %vm383_vm0, %v1754_v35, 0.0 }
 0x5c7   : > { %1853 = vst.msk [vmem:[%s3259_s14] sm:$0xff] %vm383_vm0, %v1841_v30  ;;  %v1844_v16 = vadd.f32 %v3252_v13, %v1809_v0  ;;  %v1803_v49 = vadd.f32 %v1802_v8, %v1801_v36 }
 0x5c9   : > { %1856 = vst.msk [vmem:[%s3259_s14 + $0x18] sm:$0xff] %vm383_vm0, %v1844_v16  ;;  %v1842_v6 = vadd.f32 %v3252_v13, %v1803_v49 }
 0x5cb   : > { %1854 = vst.msk [vmem:[%s3259_s14 + $0x8] sm:$0xff] %vm383_vm0, %v1842_v6 }
 0x5cf   : > { %v2262_v42 = vpop.f32.mrf.mxu1 }
 0x5d0   : > { %v1817_v41 = vsel %vm383_vm0, %v2262_v42, 0.0 }
 0x5d1   : > { %v1818_v20 = vadd.f32 %v1817_v41, %v1816_v25  ;;  %v1767_v7 = vpop.f32.mrf.mxu1 }
 0x5d2   : > { %v1811_v17 = vsel %vm383_vm0, %v1767_v7, 0.0 }
 0x5d3   : > { %v1847_v4 = vadd.f32 %v3252_v13, %v1818_v20  ;;  %v1812_v52 = vadd.f32 %v1811_v17, %v1810_v15  ;;  %v2263_v53 = vpop.f32.mrf.mxu1 }
 0x5d4   : > { %v1820_v46 = vsel %vm383_vm0, %v2263_v53, 0.0 }
 0x5d5   : > { %1859 = vst.msk [vmem:[%s3259_s14 + $0x30] sm:$0xff] %vm383_vm0, %v1847_v4  ;;  %v1845_v54 = vadd.f32 %v3252_v13, %v1812_v52  ;;  %v1821_v26 = vadd.f32 %v1820_v46, %v1819_v9  ;;  %v1770_v29 = vpop.f32.mrf.mxu1 }
 0x5d6   : > { %v1814_v58 = vsel %vm383_vm0, %v1770_v29, 0.0 }
 0x5d7   : > { %1857 = vst.msk [vmem:[%s3259_s14 + $0x20] sm:$0xff] %vm383_vm0, %v1845_v54  ;;  %v1848_v57 = vadd.f32 %v3252_v13, %v1821_v26  ;;  %v1815_v51 = vadd.f32 %v1814_v58, %v1813_v10  ;;  %v2266_v1 = vpop.f32.mrf.mxu1 }
 0x5d8   : > { %v1829_v59 = vsel %vm383_vm0, %v2266_v1, 0.0 }
 0x5d9   : > { %1860 = vst.msk [vmem:[%s3259_s14 + $0x38] sm:$0xff] %vm383_vm0, %v1848_v57  ;;  %v1846_v31 = vadd.f32 %v3252_v13, %v1815_v51  ;;  %v1830_v23 = vadd.f32 %v1829_v59, %v1828_v18  ;;  %v1783_v3 = vpop.f32.mrf.mxu1 }
 0x5da   : > { %v1823_v2 = vsel %vm383_vm0, %v1783_v3, 0.0 }
 0x5db   : > { %1858 = vst.msk [vmem:[%s3259_s14 + $0x28] sm:$0xff] %vm383_vm0, %v1846_v31  ;;  %v1851_v22 = vadd.f32 %v3252_v13, %v1830_v23  ;;  %v1824_v28 = vadd.f32 %v1823_v2, %v1822_v62  ;;  %v2267_v32 = vpop.f32.mrf.mxu1 }
 0x5dc   : > { %v1832_v44 = vsel %vm383_vm0, %v2267_v32, 0.0 }
 0x5dd   : > { %1863 = vst.msk [vmem:[%s3259_s14 + $0x50] sm:$0xff] %vm383_vm0, %v1851_v22  ;;  %v1849_v11 = vadd.f32 %v3252_v13, %v1824_v28  ;;  %v1833_v33 = vadd.f32 %v1832_v44, %v1831_v5  ;;  %v1786_v43 = vpop.f32.mrf.mxu1 }
 0x5de   : > { %v1826_v48 = vsel %vm383_vm0, %v1786_v43, 0.0 }
 0x5df   : > { %1861 = vst.msk [vmem:[%s3259_s14 + $0x40] sm:$0xff] %vm383_vm0, %v1849_v11  ;;  %v1852_v47 = vadd.f32 %v3252_v13, %v1833_v33  ;;  %v1827_v37 = vadd.f32 %v1826_v48, %v1825_v27 }
 0x5e1   : > { %1864 = vst.msk [vmem:[%s3259_s14 + $0x58] sm:$0xff] %vm383_vm0, %v1852_v47  ;;  %v1850_v39 = vadd.f32 %v3252_v13, %v1827_v37 }
 0x5e3   : > { %1862 = vst.msk [vmem:[%s3259_s14 + $0x48] sm:$0xff] %vm383_vm0, %v1850_v39 }
 0x5e4   : > { %2594 = shalt.err (!%p2591_p10)
}
 0x5e5   : > { %s2595_s10 = scalar_lea.hbm %s3314_s30, 1536  ;;  %s2599_s9 = scalar_lea.hbm %s3370_s6, 3072 }
 0x5e6   : > { %p2596_p6 = scmp.ne.s32.totalorder %s3314_s30, %s2595_s10  ;;  %p2600_p3 = scmp.lt.s32.totalorder %s3314_s30, %s3370_s6 }
 0x5e7   : > { %p2601_p11 = scmp.lt.s32.totalorder %s2599_s9, %s2595_s10 }
 0x5e8   : > { %p2597_p4 = pnand %p2596_p6, %p3391_p1 }
 0x5e9   : > { %p2602_p5 = por %p2601_p11, %p2600_p3 }
 0x5ea   : > { %p2598_p8 = pneg %p2597_p4 }
 0x5ec   : > { %p2603_p7 = pnand %p2602_p5, %p2598_p8 }
 0x5ee   : > { %2606 = shalt.err (!%p2603_p7)
}
 0x5ef   : > { %s2667_s19 = smov 128   ;;  %s2668_s25 = smov 8  }
 0x5f0   : > { %2297 = dma.vmem_to_hbm [thread:$0]  (%p3391_p1), %s3316_s16, 1536, %s3314_s30, %s1866_s8, %s2667_s19, %s2667_s19, %s2668_s25  }
 0x5f1 PF: > { %s1895_s27 = sand.u32 1, %s2641_s21   ;;  %p3392_p12 = scmp.ne.s32.totalorder %s3378_s28, 0 }
 0x5f2   : > { %p3393_p9 = scmp.ge.s32.totalorder %s2653_s24, 2  ;;  %s1896_s29 = scalar_lea.sflag [#allocation4], %s1895_s27 }
 0x5f4   : > { %p2314_p13 = pnand %p3393_p9, %p3392_p12 }
 0x5f6   : > { %p2315_p0 = pneg %p2314_p13 }
 0x5f8   : > { %2636 = dma.done.wait (%p2315_p0), %s1896_s29, 1536  }
 0x5f9   : > { %2638 = vsyncadd (%p2315_p0), %s1896_s29, 4294965760  ;;  %p21_p2 = scmp.ge.s32.totalorder %s2790_s11, 4   ;;  %s3394_s21 = smov %s2645_s22 }
 0x5fa   : > { %s3395_s22 = smov %s2649_s23  ;;  %s3396_s23 = smov %s2800_s17 }
 0x5fb   : > { %s3397_s24 = smov %s2790_s11  ;;  %23 = sbr.rel (!%p21_p2) target bundleno = 7 (0x7), region = 101 }
 0x600   :  { %1901 = vsyncpa [#allocation3], 1 }
 0x601   :  { %1903 = vsyncpa [#allocation3 + $0x1], 1 }
 0x602   :  { %1904 = vsyncpa [#allocation6], 1 }
 0x603   :  { %1905 = vsyncpa [#allocation9], 1 }
 0x604   :  { %1906 = vsyncpa [#allocation4], 1 }
 0x605   :  { %1908 = vsyncpa [#allocation4 + $0x1], 1 }

</bundles_post_ra>
